<compile_context>
chip_gen: v6e
topology: v6e:2x2x1
jax: 0.10.0
libtpu: 0.0.40
codegen_flags: <defaults>
</compile_context>

<pallas_src>
import jax
import jax.numpy as jnp
from jax import lax
from jax.experimental import pallas as pl
from jax.experimental.pallas import tpu as pltpu


_UNROLL_MAX_T = 32   # fully unroll the merged time loop up to this sequence length


def make_bilstm_layer_kernel(T, H, D_in, H_in, Bt, last):
    """Build the kernel for one bidirectional LSTM layer (+ fused fc/tanh if `last`).

    Kernel refs:
      x_ref   : (D_in, T, Bt, H_in) f32  direction-major layer input (D_in=1 for layer 0)
      len_ref : (Bt, 1) int32            valid lengths (0 => fully padded row)
      wih_ref : (D_in*H_in, 8H) f32      [W_ih_f.T | W_ih_b.T], gate order (i,f,o,g)
      whh_*   : (H, 4H) f32              recurrent weights (transposed, reordered)
      b_ref   : (1, 8H) f32              (b_ih + b_hh), fwd|bwd
      wfc_*   : (H, H) f32, bfc (1, H)   last layer only
      out_ref : (2, T, Bt, H) f32        [0]=forward hiddens, [1]=backward hiddens
      hc_ref  : (2, Bt, H) f32           last layer only: [0]=tanh(fc(h)), [1]=tanh(fc(c))
      gih_ref : (T*Bt, 8H) f32 scratch   hoisted input-to-hidden pre-gates
    """
    H3, H4, H8 = 3 * H, 4 * H, 8 * H

    def _body(x_ref, len_ref, wih_ref, whh_f_ref, whh_b_ref, b_ref,
              wfc_f_ref, wfc_b_ref, bfc_ref, out_ref, hc_ref, gih_ref):
        lengths = len_ref[...]                              # (Bt, 1) int32
        whh_f = whh_f_ref[...]                              # (H, 4H)
        whh_b = whh_b_ref[...]

        # ---- hoisted input-to-hidden pre-pass: one big MXU matmul (M=T*Bt, N=8H) ----
        acc = jnp.dot(x_ref[0].reshape(T * Bt, H_in), wih_ref[0:H_in, :],
                      preferred_element_type=jnp.float32)
        for d in range(1, D_in):                            # D_in is 1 or 2 (static)
            acc = acc + jnp.dot(x_ref[d].reshape(T * Bt, H_in),
                                wih_ref[d * H_in:(d + 1) * H_in, :],
                                preferred_element_type=jnp.float32)
        gih_ref[...] = acc + b_ref[...]                     # fwd gates | bwd gates

        def cell_step(h, c, g_pre, whh):
            # gate order (i, f, o, g): one sigmoid over 3H columns + one tanh
            gates = g_pre + jnp.dot(h, whh, preferred_element_type=jnp.float32)
            sg = jax.nn.sigmoid(gates[:, 0:H3])
            gg = jnp.tanh(gates[:, H3:H4])
            c_new = sg[:, H:2 * H] * c + sg[:, 0:H] * gg
            h_new = sg[:, 2 * H:H3] * jnp.tanh(c_new)
            return h_new, c_new

        def merged_step(s_f, s_b, carry, m_f, m_b):
            # one forward step (t=s_f) and one backward step (t=s_b), interleaved
            h_f, c_f, h_b, c_b = carry
            row_f, row_b = s_f * Bt, s_b * Bt
            if not isinstance(s_f, int):                    # dynamic (fori_loop) path
                row_f = pl.multiple_of(row_f, Bt)
                row_b = pl.multiple_of(row_b, Bt)
            g_f = gih_ref[pl.ds(row_f, Bt), 0:H4]
            g_b = gih_ref[pl.ds(row_b, Bt), H4:H8]
            hf_s, cf_s = cell_step(h_f, c_f, g_f, whh_f)
            hb_s, cb_s = cell_step(h_b, c_b, g_b, whh_b)
            out_ref[0, s_f] = jnp.where(m_f, hf_s, 0.0)     # full last-dim (Bt, H) stores
            out_ref[1, s_b] = jnp.where(m_b, hb_s, 0.0)
            h_f = jnp.where(m_f, hf_s, h_f)                 # carry frozen past length
            c_f = jnp.where(m_f, cf_s, c_f)
            h_b = jnp.where(m_b, hb_s, h_b)                 # stays zero until t < length
            c_b = jnp.where(m_b, cb_s, c_b)
            return h_f, c_f, h_b, c_b

        zeros = jnp.zeros((Bt, H), jnp.float32)
        carry = (zeros, zeros, zeros, zeros)

        if T <= _UNROLL_MAX_T:
            # validity mask precomputed once (JAX does not CSE broadcasts in unrolled loops)
            mask = (lax.broadcasted_iota(jnp.int32, (T, Bt, 1), 0)
                    < lengths[None, :, :])                  # (T, Bt, 1) bool
            for s in range(T):
                t_b = T - 1 - s
                carry = merged_step(s, t_b, carry, mask[s], mask[t_b])
        else:
            def loop_body(s, carry):
                t_b = T - 1 - s
                return merged_step(s, t_b, carry, s < lengths, t_b < lengths)
            carry = lax.fori_loop(0, T, loop_body, carry, unroll=2)

        h_f, c_f, h_b, c_b = carry

        if last:
            # fused fc + tanh; concat eliminated via split per-direction matmuls
            wfc_f = wfc_f_ref[...]
            wfc_b = wfc_b_ref[...]
            bfc = bfc_ref[...]
            hc_ref[0] = jnp.tanh(
                jnp.dot(h_f, wfc_f, preferred_element_type=jnp.float32)
                + jnp.dot(h_b, wfc_b, preferred_element_type=jnp.float32) + bfc)
            hc_ref[1] = jnp.tanh(
                jnp.dot(c_f, wfc_f, preferred_element_type=jnp.float32)
                + jnp.dot(c_b, wfc_b, preferred_element_type=jnp.float32) + bfc)

    if last:
        def kernel(x_ref, len_ref, wih_ref, whh_f_ref, whh_b_ref, b_ref,
                   wfc_f_ref, wfc_b_ref, bfc_ref, out_ref, hc_ref, gih_ref):
            _body(x_ref, len_ref, wih_ref, whh_f_ref, whh_b_ref, b_ref,
                  wfc_f_ref, wfc_b_ref, bfc_ref, out_ref, hc_ref, gih_ref)
    else:
        def kernel(x_ref, len_ref, wih_ref, whh_f_ref, whh_b_ref, b_ref,
                   out_ref, gih_ref):
            _body(x_ref, len_ref, wih_ref, whh_f_ref, whh_b_ref, b_ref,
                  None, None, None, out_ref, None, gih_ref)
    return kernel


def _reorder_gates(w, H):
    """Reorder PyTorch gate blocks (i, f, g, o) along axis 0 -> (i, f, o, g)."""
    return jnp.concatenate([w[0:H], w[H:2 * H], w[3 * H:4 * H], w[2 * H:3 * H]], axis=0)


def init_params(key, vocab_size, embedding_dim, hidden_dim, n_layers, pad_idx):
    """Params already in kernel layout (transposed, gate-reordered, biases pre-summed)."""
    H = hidden_dim
    ks = jax.random.split(key, 1 + 8 * n_layers + 2)
    it = iter(ks)

    emb = jax.random.normal(next(it), (vocab_size, embedding_dim), jnp.float32)
    emb = emb.at[pad_idx].set(0.0)                  # nn.Embedding(padding_idx=pad_idx)

    k_lstm = 1.0 / (H ** 0.5)

    def u(k, shape, scale):
        return jax.random.uniform(k, shape, jnp.float32, -scale, scale)

    layers = []
    in_dim = embedding_dim
    for _ in range(n_layers):
        wih_f = _reorder_gates(u(next(it), (4 * H, in_dim), k_lstm), H)   # PyTorch (4H, in)
        whh_f = _reorder_gates(u(next(it), (4 * H, H), k_lstm), H)
        bih_f = _reorder_gates(u(next(it), (4 * H,), k_lstm), H)
        bhh_f = _reorder_gates(u(next(it), (4 * H,), k_lstm), H)
        wih_b = _reorder_gates(u(next(it), (4 * H, in_dim), k_lstm), H)
        whh_b = _reorder_gates(u(next(it), (4 * H, H), k_lstm), H)
        bih_b = _reorder_gates(u(next(it), (4 * H,), k_lstm), H)
        bhh_b = _reorder_gates(u(next(it), (4 * H,), k_lstm), H)
        layers.append({
            "wih": jnp.concatenate([wih_f.T, wih_b.T], axis=1),          # (in_dim, 8H)
            "whh_f": whh_f.T, "whh_b": whh_b.T,                          # (H, 4H)
            "b": jnp.concatenate([bih_f + bhh_f, bih_b + bhh_b])[None, :],  # (1, 8H)
        })
        in_dim = 2 * H                              # next layer consumes bidirectional output

    k_fc = 1.0 / ((2 * H) ** 0.5)
    w_fc = u(next(it), (H, 2 * H), k_fc)            # PyTorch Linear layout (out, in)
    b_fc = u(next(it), (H,), k_fc)
    return {
        "embedding": emb,
        "layers": layers,
        # fc split so the kernel never concatenates (h_fwd, h_bwd)
        "wfc_f": w_fc[:, 0:H].T, "wfc_b": w_fc[:, H:].T, "b_fc": b_fc[None, :],
    }


def encoder_article_rnn_forward(params, text, text_lengths):
    """text: (T, B) int32 token ids (time-major); text_lengths: (B,), sorted descending.

    Returns (encoder_outputs (T', B, 2H), hidden (B, H), cell (B, H)), T' = max(text_lengths).
    """
    T, B = text.shape
    H = params["b_fc"].shape[1]
    n_layers = len(params["layers"])

    lengths = jnp.asarray(text_lengths, jnp.int32)

    # Embedding gather in plain JAX (no efficient in-kernel gather at this scale).
    embedded = jnp.take(params["embedding"], text, axis=0)              # (T, B, E) time-major
    # TODO(synk): nn.Dropout / inter-layer LSTM dropout are identity in eval mode; not applied.

    # Batch tiling: pad B to a multiple of the sublane-aligned batch tile; padded
    # rows get length 0 (fully masked) and are sliced off at the end.
    Bt = min(128, ((B + 7) // 8) * 8)
    n_b = -(-B // Bt)
    B_pad = n_b * Bt
    if B_pad != B:
        embedded = jnp.pad(embedded, ((0, 0), (0, B_pad - B), (0, 0)))
        lengths_p = jnp.pad(lengths, (0, B_pad - B))
    else:
        lengths_p = lengths
    len2d = lengths_p.reshape(B_pad, 1)

    x = embedded[None]                                                  # (1, T, B_pad, E)
    hc = None
    for li, layer in enumerate(params["layers"]):
        last = li == n_layers - 1
        D_in, _, _, H_in = x.shape
        kernel = make_bilstm_layer_kernel(T, H, D_in, H_in, Bt, last)

        full = lambda shape: pl.BlockSpec(shape, lambda b: (0,) * len(shape))
        in_specs = [
            pl.BlockSpec((D_in, T, Bt, H_in), lambda b: (0, 0, b, 0)),
            pl.BlockSpec((Bt, 1), lambda b: (b, 0)),
            full((D_in * H_in, 8 * H)),
            full((H, 4 * H)),
            full((H, 4 * H)),
            full((1, 8 * H)),
        ]
        inputs = [x, len2d, layer["wih"], layer["whh_f"], layer["whh_b"], layer["b"]]
        out_spec = pl.BlockSpec((2, T, Bt, H), lambda b: (0, 0, b, 0))

        if last:
            in_specs += [full((H, H)), full((H, H)), full((1, H))]
            inputs += [params["wfc_f"], params["wfc_b"], params["b_fc"]]
            out_shape = (jax.ShapeDtypeStruct((2, T, B_pad, H), jnp.float32),
                         jax.ShapeDtypeStruct((2, B_pad, H), jnp.float32))
            out_specs = (out_spec, pl.BlockSpec((2, Bt, H), lambda b: (0, b, 0)))
        else:
            out_shape = jax.ShapeDtypeStruct((2, T, B_pad, H), jnp.float32)
            out_specs = out_spec

        # VMEM budget: double-buffered I/O blocks + pre-gate scratch + headroom.
        io_block_bytes = 4 * (D_in * T * Bt * H_in + Bt + D_in * H_in * 8 * H
                              + 2 * H * 4 * H + 8 * H + 2 * T * Bt * H
                              + (2 * H * H + H + 2 * Bt * H if last else 0))
        scratch_bytes = 4 * T * Bt * 8 * H
        vmem_limit = int(min(96 * 1024 * 1024,
                             max(32 * 1024 * 1024,
                                 3 * io_block_bytes + scratch_bytes + (4 << 20))))

        flops = (2 * T * B_pad * (D_in * H_in) * 8 * H      # hoisted input matmuls
                 + 2 * T * B_pad * H * 4 * H * 2)           # recurrent matmuls (both dirs)
        transcendentals = 5 * T * B_pad * 2 * H
        if last:
            flops += 4 * 2 * B_pad * H * H
            transcendentals += 4 * B_pad * H
        bytes_accessed = n_b * io_block_bytes

        result = pl.pallas_call(
            kernel,
            out_shape=out_shape,
            grid_spec=pltpu.PrefetchScalarGridSpec(
                num_scalar_prefetch=0,
                grid=(n_b,),
                in_specs=in_specs,
                out_specs=out_specs,
                scratch_shapes=[pltpu.VMEM((T * Bt, 8 * H), jnp.float32)]),
            compiler_params=pltpu.CompilerParams(
                dimension_semantics=("parallel",),
                vmem_limit_bytes=vmem_limit),
            cost_estimate=pl.CostEstimate(
                flops=int(flops),
                transcendentals=int(transcendentals),
                bytes_accessed=int(bytes_accessed)),
        )(*inputs)

        if last:
            x, hc = result
        else:
            x = result

    # pad_packed_sequence trims the time axis to max(text_lengths). Host-side trim
    # (do not wrap this function in jax.jit as-is; trim outside a jit boundary instead).
    t_out = int(jax.device_get(jnp.max(lengths)))
    encoder_outputs = jnp.concatenate(
        [x[0, :t_out, :B, :], x[1, :t_out, :B, :]], axis=-1)            # (T', B, 2H)
    hidden = hc[0, :B, :]
    cell = hc[1, :B, :]
    return encoder_outputs, hidden, cell


if __name__ == "__main__":
    # small, deterministic shapes
    vocab_size = 50
    embedding_dim = 16
    hidden_dim = 32
    n_layers = 2
    bidirectional = True            # module requires it (fc takes hidden_dim * 2)
    pad_idx = 0
    T, B = 8, 2

    key = jax.random.PRNGKey(0)
    kp, kt = jax.random.split(key)
    params = init_params(kp, vocab_size, embedding_dim, hidden_dim, n_layers, pad_idx)

    text = jax.random.randint(kt, (T, B), 1, vocab_size, dtype=jnp.int32)
    text_lengths = jnp.array([8, 5], dtype=jnp.int32)   # sorted descending (pack_padded_sequence)
    # zero out padded token positions like a real padded batch
    t_idx = jnp.arange(T)[:, None]
    text = jnp.where(t_idx < text_lengths[None, :], text, pad_idx)

    enc_out, hidden, cell = encoder_article_rnn_forward(params, text, text_lengths)
    jax.block_until_ready((enc_out, hidden, cell))

    assert enc_out.shape == (T, B, 2 * hidden_dim), enc_out.shape
    assert hidden.shape == (B, hidden_dim), hidden.shape
    assert cell.shape == (B, hidden_dim), cell.shape
    print("KERNEL_OK")
</pallas_src>

<mosaic_0001>
module attributes {stable_mosaic.version = 11 : i64} {
  func.func @kernel(%arg0: i32, %arg1: memref<1x8x8x16xf32, #tpu.memory_space<vmem>>, %arg2: memref<8x1xi32, #tpu.memory_space<vmem>>, %arg3: memref<16x256xf32, #tpu.memory_space<vmem>>, %arg4: memref<32x128xf32, #tpu.memory_space<vmem>>, %arg5: memref<32x128xf32, #tpu.memory_space<vmem>>, %arg6: memref<1x256xf32, #tpu.memory_space<vmem>>, %arg7: memref<2x8x8x32xf32, #tpu.memory_space<vmem>>, %arg8: memref<64x256xf32, #tpu.memory_space<vmem>>) attributes {dimension_semantics = [#tpu.dimension_semantics<parallel>], iteration_bounds = array<i64: 1>, scalar_prefetch = 0 : i64, scratch_operands = 1 : i64, tpu.core_type = #tpu.core_type<tc>, window_params = [{transform_indices = @transform_0, window_bounds = array<i64: 1, 8, 8, 16>}, {transform_indices = @transform_1, window_bounds = array<i64: 8, 1>}, {pipeline_mode = #tpu.pipeline_mode<synchronous>, transform_indices = @transform_2, window_bounds = array<i64: 16, 256>}, {pipeline_mode = #tpu.pipeline_mode<synchronous>, transform_indices = @transform_3, window_bounds = array<i64: 32, 128>}, {pipeline_mode = #tpu.pipeline_mode<synchronous>, transform_indices = @transform_4, window_bounds = array<i64: 32, 128>}, {pipeline_mode = #tpu.pipeline_mode<synchronous>, transform_indices = @transform_5, window_bounds = array<i64: 1, 256>}, {transform_indices = @transform_6, window_bounds = array<i64: 2, 8, 8, 32>}]} {
    %c0 = arith.constant 0 : index
    %c0_0 = arith.constant 0 : index
    %0 = vector.load %arg2[%c0, %c0_0] : memref<8x1xi32, #tpu.memory_space<vmem>>, vector<8x1xi32>
    %c0_1 = arith.constant 0 : index
    %c0_2 = arith.constant 0 : index
    %1 = vector.load %arg4[%c0_1, %c0_2] : memref<32x128xf32, #tpu.memory_space<vmem>>, vector<32x128xf32>
    %c0_3 = arith.constant 0 : index
    %c0_4 = arith.constant 0 : index
    %2 = vector.load %arg5[%c0_3, %c0_4] : memref<32x128xf32, #tpu.memory_space<vmem>>, vector<32x128xf32>
    %c0_5 = arith.constant 0 : index
    %c0_6 = arith.constant 0 : index
    %c0_7 = arith.constant 0 : index
    %c0_8 = arith.constant 0 : index
    %3 = vector.load %arg1[%c0_5, %c0_6, %c0_7, %c0_8] : memref<1x8x8x16xf32, #tpu.memory_space<vmem>>, vector<1x8x8x16xf32>
    %4 = vector.shape_cast %3 : vector<1x8x8x16xf32> to vector<8x8x16xf32>
    %5 = vector.shape_cast %4 : vector<8x8x16xf32> to vector<64x16xf32>
    %c0_9 = arith.constant 0 : index
    %c0_10 = arith.constant 0 : index
    %6 = vector.load %arg3[%c0_9, %c0_10] : memref<16x256xf32, #tpu.memory_space<vmem>>, vector<16x256xf32>
    %cst = arith.constant dense<0.000000e+00> : vector<64x256xf32>
    %7 = tpu.matmul %5, %6, %cst {dimension_numbers = #tpu.dot_dimension_numbers<[1], [0], [0], [1], [0, 0, 1, 1], [], []>} : vector<64x16xf32>, vector<16x256xf32>, vector<64x256xf32> -> vector<64x256xf32>
    %c0_11 = arith.constant 0 : index
    %c0_12 = arith.constant 0 : index
    %8 = vector.load %arg6[%c0_11, %c0_12] : memref<1x256xf32, #tpu.memory_space<vmem>>, vector<1x256xf32>
    %9 = vector.broadcast %8 : vector<1x256xf32> to vector<64x256xf32>
    %10 = arith.addf %7, %9 : vector<64x256xf32>
    %c0_13 = arith.constant 0 : index
    %c0_14 = arith.constant 0 : index
    %11 = vector.load %arg8[%c0_13, %c0_14] : memref<64x256xf32, #tpu.memory_space<vmem>>, vector<64x256xf32>
    tpu.vector_store %arg8[%c0_13, %c0_14], %10 {strides = array<i32>} : memref<64x256xf32, #tpu.memory_space<vmem>>, vector<64x256xf32>,
    %cst_15 = arith.constant 0.000000e+00 : f32
    %12 = vector.broadcast %cst_15 : f32 to vector<8x32xf32>
    %13 = tpu.iota {dimensions = array<i32: 0>} : vector<8x8x1xi32>
    %14 = vector.shape_cast %0 : vector<8x1xi32> to vector<1x8x1xi32>
    %15 = vector.broadcast %14 : vector<1x8x1xi32> to vector<8x8x1xi32>
    %16 = arith.cmpi slt, %13, %15 : vector<8x8x1xi32>
    %17 = vector.extract_strided_slice %16 {offsets = [0, 0, 0], sizes = [1, 8, 1], strides = [1, 1, 1]} : vector<8x8x1xi1> to vector<1x8x1xi1>
    %18 = vector.shape_cast %17 : vector<1x8x1xi1> to vector<8x1xi1>
    %19 = vector.extract_strided_slice %16 {offsets = [7, 0, 0], sizes = [1, 8, 1], strides = [1, 1, 1]} : vector<8x8x1xi1> to vector<1x8x1xi1>
    %20 = vector.shape_cast %19 : vector<1x8x1xi1> to vector<8x1xi1>
    %c0_16 = arith.constant 0 : index
    %c0_17 = arith.constant 0 : index
    %21 = vector.load %arg8[%c0_16, %c0_17] : memref<64x256xf32, #tpu.memory_space<vmem>>, vector<8x128xf32>
    %c56 = arith.constant 56 : index
    %c128 = arith.constant 128 : index
    %22 = vector.load %arg8[%c56, %c128] : memref<64x256xf32, #tpu.memory_space<vmem>>, vector<8x128xf32>
    %cst_18 = arith.constant dense<0.000000e+00> : vector<8x128xf32>
    %23 = tpu.matmul %12, %1, %cst_18 {dimension_numbers = #tpu.dot_dimension_numbers<[1], [0], [0], [1], [0, 0, 1, 1], [], []>} : vector<8x32xf32>, vector<32x128xf32>, vector<8x128xf32> -> vector<8x128xf32>
    %24 = arith.addf %21, %23 : vector<8x128xf32>
    %25 = vector.extract_strided_slice %24 {offsets = [0, 0], sizes = [8, 96], strides = [1, 1]} : vector<8x128xf32> to vector<8x96xf32>
    %26 = arith.negf %25 : vector<8x96xf32>
    %27 = math.exp %26 : vector<8x96xf32>
    %cst_19 = arith.constant 1.000000e+00 : f32
    %28 = vector.broadcast %cst_19 : f32 to vector<8x96xf32>
    %29 = arith.addf %28, %27 : vector<8x96xf32>
    %30 = arith.divf %28, %29 : vector<8x96xf32>
    %31 = vector.extract_strided_slice %24 {offsets = [0, 96], sizes = [8, 32], strides = [1, 1]} : vector<8x128xf32> to vector<8x32xf32>
    %32 = math.tanh %31 : vector<8x32xf32>
    %33 = vector.extract_strided_slice %30 {offsets = [0, 32], sizes = [8, 32], strides = [1, 1]} : vector<8x96xf32> to vector<8x32xf32>
    %34 = arith.mulf %33, %12 : vector<8x32xf32>
    %35 = vector.extract_strided_slice %30 {offsets = [0, 0], sizes = [8, 32], strides = [1, 1]} : vector<8x96xf32> to vector<8x32xf32>
    %36 = arith.mulf %35, %32 : vector<8x32xf32>
    %37 = arith.addf %34, %36 : vector<8x32xf32>
    %38 = vector.extract_strided_slice %30 {offsets = [0, 64], sizes = [8, 32], strides = [1, 1]} : vector<8x96xf32> to vector<8x32xf32>
    %39 = math.tanh %37 : vector<8x32xf32>
    %40 = arith.mulf %38, %39 : vector<8x32xf32>
    %cst_20 = arith.constant dense<0.000000e+00> : vector<8x128xf32>
    %41 = tpu.matmul %12, %2, %cst_20 {dimension_numbers = #tpu.dot_dimension_numbers<[1], [0], [0], [1], [0, 0, 1, 1], [], []>} : vector<8x32xf32>, vector<32x128xf32>, vector<8x128xf32> -> vector<8x128xf32>
    %42 = arith.addf %22, %41 : vector<8x128xf32>
    %43 = vector.extract_strided_slice %42 {offsets = [0, 0], sizes = [8, 96], strides = [1, 1]} : vector<8x128xf32> to vector<8x96xf32>
    %44 = arith.negf %43 : vector<8x96xf32>
    %45 = math.exp %44 : vector<8x96xf32>
    %cst_21 = arith.constant 1.000000e+00 : f32
    %46 = vector.broadcast %cst_21 : f32 to vector<8x96xf32>
    %47 = arith.addf %46, %45 : vector<8x96xf32>
    %48 = arith.divf %46, %47 : vector<8x96xf32>
    %49 = vector.extract_strided_slice %42 {offsets = [0, 96], sizes = [8, 32], strides = [1, 1]} : vector<8x128xf32> to vector<8x32xf32>
    %50 = math.tanh %49 : vector<8x32xf32>
    %51 = vector.extract_strided_slice %48 {offsets = [0, 32], sizes = [8, 32], strides = [1, 1]} : vector<8x96xf32> to vector<8x32xf32>
    %52 = arith.mulf %51, %12 : vector<8x32xf32>
    %53 = vector.extract_strided_slice %48 {offsets = [0, 0], sizes = [8, 32], strides = [1, 1]} : vector<8x96xf32> to vector<8x32xf32>
    %54 = arith.mulf %53, %50 : vector<8x32xf32>
    %55 = arith.addf %52, %54 : vector<8x32xf32>
    %56 = vector.extract_strided_slice %48 {offsets = [0, 64], sizes = [8, 32], strides = [1, 1]} : vector<8x96xf32> to vector<8x32xf32>
    %57 = math.tanh %55 : vector<8x32xf32>
    %58 = arith.mulf %56, %57 : vector<8x32xf32>
    %cst_22 = arith.constant 0.000000e+00 : f32
    %59 = vector.shape_cast %18 : vector<8x1xi1> to vector<8x1xi1>
    %60 = vector.broadcast %59 : vector<8x1xi1> to vector<8x32xi1>
    %61 = vector.broadcast %cst_22 : f32 to vector<8x32xf32>
    %62 = arith.select %60, %40, %61 : vector<8x32xi1>, vector<8x32xf32>
    %c0_23 = arith.constant 0 : index
    %c0_24 = arith.constant 0 : index
    %c0_25 = arith.constant 0 : index
    %c0_26 = arith.constant 0 : index
    %63 = vector.load %arg7[%c0_23, %c0_24, %c0_25, %c0_26] : memref<2x8x8x32xf32, #tpu.memory_space<vmem>>, vector<1x1x8x32xf32>
    %64 = vector.shape_cast %63 : vector<1x1x8x32xf32> to vector<8x32xf32>
    %65 = vector.shape_cast %62 : vector<8x32xf32> to vector<1x1x8x32xf32>
    tpu.vector_store %arg7[%c0_23, %c0_24, %c0_25, %c0_26], %65 {strides = array<i32>} : memref<2x8x8x32xf32, #tpu.memory_space<vmem>>, vector<1x1x8x32xf32>,
    %cst_27 = arith.constant 0.000000e+00 : f32
    %66 = vector.shape_cast %20 : vector<8x1xi1> to vector<8x1xi1>
    %67 = vector.broadcast %66 : vector<8x1xi1> to vector<8x32xi1>
    %68 = vector.broadcast %cst_27 : f32 to vector<8x32xf32>
    %69 = arith.select %67, %58, %68 : vector<8x32xi1>, vector<8x32xf32>
    %c1 = arith.constant 1 : index
    %c7 = arith.constant 7 : index
    %c0_28 = arith.constant 0 : index
    %c0_29 = arith.constant 0 : index
    %70 = vector.load %arg7[%c1, %c7, %c0_28, %c0_29] : memref<2x8x8x32xf32, #tpu.memory_space<vmem>>, vector<1x1x8x32xf32>
    %71 = vector.shape_cast %70 : vector<1x1x8x32xf32> to vector<8x32xf32>
    %72 = vector.shape_cast %69 : vector<8x32xf32> to vector<1x1x8x32xf32>
    tpu.vector_store %arg7[%c1, %c7, %c0_28, %c0_29], %72 {strides = array<i32>} : memref<2x8x8x32xf32, #tpu.memory_space<vmem>>, vector<1x1x8x32xf32>,
    %73 = vector.shape_cast %18 : vector<8x1xi1> to vector<8x1xi1>
    %74 = vector.broadcast %73 : vector<8x1xi1> to vector<8x32xi1>
    %75 = arith.select %74, %40, %12 : vector<8x32xi1>, vector<8x32xf32>
    %76 = vector.shape_cast %18 : vector<8x1xi1> to vector<8x1xi1>
    %77 = vector.broadcast %76 : vector<8x1xi1> to vector<8x32xi1>
    %78 = arith.select %77, %37, %12 : vector<8x32xi1>, vector<8x32xf32>
    %79 = vector.shape_cast %20 : vector<8x1xi1> to vector<8x1xi1>
    %80 = vector.broadcast %79 : vector<8x1xi1> to vector<8x32xi1>
    %81 = arith.select %80, %58, %12 : vector<8x32xi1>, vector<8x32xf32>
    %82 = vector.shape_cast %20 : vector<8x1xi1> to vector<8x1xi1>
    %83 = vector.broadcast %82 : vector<8x1xi1> to vector<8x32xi1>
    %84 = arith.select %83, %55, %12 : vector<8x32xi1>, vector<8x32xf32>
    %85 = vector.extract_strided_slice %16 {offsets = [1, 0, 0], sizes = [1, 8, 1], strides = [1, 1, 1]} : vector<8x8x1xi1> to vector<1x8x1xi1>
    %86 = vector.shape_cast %85 : vector<1x8x1xi1> to vector<8x1xi1>
    %87 = vector.extract_strided_slice %16 {offsets = [6, 0, 0], sizes = [1, 8, 1], strides = [1, 1, 1]} : vector<8x8x1xi1> to vector<1x8x1xi1>
    %88 = vector.shape_cast %87 : vector<1x8x1xi1> to vector<8x1xi1>
    %c8 = arith.constant 8 : index
    %c0_30 = arith.constant 0 : index
    %89 = vector.load %arg8[%c8, %c0_30] : memref<64x256xf32, #tpu.memory_space<vmem>>, vector<8x128xf32>
    %c48 = arith.constant 48 : index
    %c128_31 = arith.constant 128 : index
    %90 = vector.load %arg8[%c48, %c128_31] : memref<64x256xf32, #tpu.memory_space<vmem>>, vector<8x128xf32>
    %cst_32 = arith.constant dense<0.000000e+00> : vector<8x128xf32>
    %91 = tpu.matmul %75, %1, %cst_32 {dimension_numbers = #tpu.dot_dimension_numbers<[1], [0], [0], [1], [0, 0, 1, 1], [], []>} : vector<8x32xf32>, vector<32x128xf32>, vector<8x128xf32> -> vector<8x128xf32>
    %92 = arith.addf %89, %91 : vector<8x128xf32>
    %93 = vector.extract_strided_slice %92 {offsets = [0, 0], sizes = [8, 96], strides = [1, 1]} : vector<8x128xf32> to vector<8x96xf32>
    %94 = arith.negf %93 : vector<8x96xf32>
    %95 = math.exp %94 : vector<8x96xf32>
    %cst_33 = arith.constant 1.000000e+00 : f32
    %96 = vector.broadcast %cst_33 : f32 to vector<8x96xf32>
    %97 = arith.addf %96, %95 : vector<8x96xf32>
    %98 = arith.divf %96, %97 : vector<8x96xf32>
    %99 = vector.extract_strided_slice %92 {offsets = [0, 96], sizes = [8, 32], strides = [1, 1]} : vector<8x128xf32> to vector<8x32xf32>
    %100 = math.tanh %99 : vector<8x32xf32>
    %101 = vector.extract_strided_slice %98 {offsets = [0, 32], sizes = [8, 32], strides = [1, 1]} : vector<8x96xf32> to vector<8x32xf32>
    %102 = arith.mulf %101, %78 : vector<8x32xf32>
    %103 = vector.extract_strided_slice %98 {offsets = [0, 0], sizes = [8, 32], strides = [1, 1]} : vector<8x96xf32> to vector<8x32xf32>
    %104 = arith.mulf %103, %100 : vector<8x32xf32>
    %105 = arith.addf %102, %104 : vector<8x32xf32>
    %106 = vector.extract_strided_slice %98 {offsets = [0, 64], sizes = [8, 32], strides = [1, 1]} : vector<8x96xf32> to vector<8x32xf32>
    %107 = math.tanh %105 : vector<8x32xf32>
    %108 = arith.mulf %106, %107 : vector<8x32xf32>
    %cst_34 = arith.constant dense<0.000000e+00> : vector<8x128xf32>
    %109 = tpu.matmul %81, %2, %cst_34 {dimension_numbers = #tpu.dot_dimension_numbers<[1], [0], [0], [1], [0, 0, 1, 1], [], []>} : vector<8x32xf32>, vector<32x128xf32>, vector<8x128xf32> -> vector<8x128xf32>
    %110 = arith.addf %90, %109 : vector<8x128xf32>
    %111 = vector.extract_strided_slice %110 {offsets = [0, 0], sizes = [8, 96], strides = [1, 1]} : vector<8x128xf32> to vector<8x96xf32>
    %112 = arith.negf %111 : vector<8x96xf32>
    %113 = math.exp %112 : vector<8x96xf32>
    %cst_35 = arith.constant 1.000000e+00 : f32
    %114 = vector.broadcast %cst_35 : f32 to vector<8x96xf32>
    %115 = arith.addf %114, %113 : vector<8x96xf32>
    %116 = arith.divf %114, %115 : vector<8x96xf32>
    %117 = vector.extract_strided_slice %110 {offsets = [0, 96], sizes = [8, 32], strides = [1, 1]} : vector<8x128xf32> to vector<8x32xf32>
    %118 = math.tanh %117 : vector<8x32xf32>
    %119 = vector.extract_strided_slice %116 {offsets = [0, 32], sizes = [8, 32], strides = [1, 1]} : vector<8x96xf32> to vector<8x32xf32>
    %120 = arith.mulf %119, %84 : vector<8x32xf32>
    %121 = vector.extract_strided_slice %116 {offsets = [0, 0], sizes = [8, 32], strides = [1, 1]} : vector<8x96xf32> to vector<8x32xf32>
    %122 = arith.mulf %121, %118 : vector<8x32xf32>
    %123 = arith.addf %120, %122 : vector<8x32xf32>
    %124 = vector.extract_strided_slice %116 {offsets = [0, 64], sizes = [8, 32], strides = [1, 1]} : vector<8x96xf32> to vector<8x32xf32>
    %125 = math.tanh %123 : vector<8x32xf32>
    %126 = arith.mulf %124, %125 : vector<8x32xf32>
    %cst_36 = arith.constant 0.000000e+00 : f32
    %127 = vector.shape_cast %86 : vector<8x1xi1> to vector<8x1xi1>
    %128 = vector.broadcast %127 : vector<8x1xi1> to vector<8x32xi1>
    %129 = vector.broadcast %cst_36 : f32 to vector<8x32xf32>
    %130 = arith.select %128, %108, %129 : vector<8x32xi1>, vector<8x32xf32>
    %c0_37 = arith.constant 0 : index
    %c1_38 = arith.constant 1 : index
    %c0_39 = arith.constant 0 : index
    %c0_40 = arith.constant 0 : index
    %131 = vector.load %arg7[%c0_37, %c1_38, %c0_39, %c0_40] : memref<2x8x8x32xf32, #tpu.memory_space<vmem>>, vector<1x1x8x32xf32>
    %132 = vector.shape_cast %131 : vector<1x1x8x32xf32> to vector<8x32xf32>
    %133 = vector.shape_cast %130 : vector<8x32xf32> to vector<1x1x8x32xf32>
    tpu.vector_store %arg7[%c0_37, %c1_38, %c0_39, %c0_40], %133 {strides = array<i32>} : memref<2x8x8x32xf32, #tpu.memory_space<vmem>>, vector<1x1x8x32xf32>,
    %cst_41 = arith.constant 0.000000e+00 : f32
    %134 = vector.shape_cast %88 : vector<8x1xi1> to vector<8x1xi1>
    %135 = vector.broadcast %134 : vector<8x1xi1> to vector<8x32xi1>
    %136 = vector.broadcast %cst_41 : f32 to vector<8x32xf32>
    %137 = arith.select %135, %126, %136 : vector<8x32xi1>, vector<8x32xf32>
    %c1_42 = arith.constant 1 : index
    %c6 = arith.constant 6 : index
    %c0_43 = arith.constant 0 : index
    %c0_44 = arith.constant 0 : index
    %138 = vector.load %arg7[%c1_42, %c6, %c0_43, %c0_44] : memref<2x8x8x32xf32, #tpu.memory_space<vmem>>, vector<1x1x8x32xf32>
    %139 = vector.shape_cast %138 : vector<1x1x8x32xf32> to vector<8x32xf32>
    %140 = vector.shape_cast %137 : vector<8x32xf32> to vector<1x1x8x32xf32>
    tpu.vector_store %arg7[%c1_42, %c6, %c0_43, %c0_44], %140 {strides = array<i32>} : memref<2x8x8x32xf32, #tpu.memory_space<vmem>>, vector<1x1x8x32xf32>,
    %141 = vector.shape_cast %86 : vector<8x1xi1> to vector<8x1xi1>
    %142 = vector.broadcast %141 : vector<8x1xi1> to vector<8x32xi1>
    %143 = arith.select %142, %108, %75 : vector<8x32xi1>, vector<8x32xf32>
    %144 = vector.shape_cast %86 : vector<8x1xi1> to vector<8x1xi1>
    %145 = vector.broadcast %144 : vector<8x1xi1> to vector<8x32xi1>
    %146 = arith.select %145, %105, %78 : vector<8x32xi1>, vector<8x32xf32>
    %147 = vector.shape_cast %88 : vector<8x1xi1> to vector<8x1xi1>
    %148 = vector.broadcast %147 : vector<8x1xi1> to vector<8x32xi1>
    %149 = arith.select %148, %126, %81 : vector<8x32xi1>, vector<8x32xf32>
    %150 = vector.shape_cast %88 : vector<8x1xi1> to vector<8x1xi1>
    %151 = vector.broadcast %150 : vector<8x1xi1> to vector<8x32xi1>
    %152 = arith.select %151, %123, %84 : vector<8x32xi1>, vector<8x32xf32>
    %153 = vector.extract_strided_slice %16 {offsets = [2, 0, 0], sizes = [1, 8, 1], strides = [1, 1, 1]} : vector<8x8x1xi1> to vector<1x8x1xi1>
    %154 = vector.shape_cast %153 : vector<1x8x1xi1> to vector<8x1xi1>
    %155 = vector.extract_strided_slice %16 {offsets = [5, 0, 0], sizes = [1, 8, 1], strides = [1, 1, 1]} : vector<8x8x1xi1> to vector<1x8x1xi1>
    %156 = vector.shape_cast %155 : vector<1x8x1xi1> to vector<8x1xi1>
    %c16 = arith.constant 16 : index
    %c0_45 = arith.constant 0 : index
    %157 = vector.load %arg8[%c16, %c0_45] : memref<64x256xf32, #tpu.memory_space<vmem>>, vector<8x128xf32>
    %c40 = arith.constant 40 : index
    %c128_46 = arith.constant 128 : index
    %158 = vector.load %arg8[%c40, %c128_46] : memref<64x256xf32, #tpu.memory_space<vmem>>, vector<8x128xf32>
    %cst_47 = arith.constant dense<0.000000e+00> : vector<8x128xf32>
    %159 = tpu.matmul %143, %1, %cst_47 {dimension_numbers = #tpu.dot_dimension_numbers<[1], [0], [0], [1], [0, 0, 1, 1], [], []>} : vector<8x32xf32>, vector<32x128xf32>, vector<8x128xf32> -> vector<8x128xf32>
    %160 = arith.addf %157, %159 : vector<8x128xf32>
    %161 = vector.extract_strided_slice %160 {offsets = [0, 0], sizes = [8, 96], strides = [1, 1]} : vector<8x128xf32> to vector<8x96xf32>
    %162 = arith.negf %161 : vector<8x96xf32>
    %163 = math.exp %162 : vector<8x96xf32>
    %cst_48 = arith.constant 1.000000e+00 : f32
    %164 = vector.broadcast %cst_48 : f32 to vector<8x96xf32>
    %165 = arith.addf %164, %163 : vector<8x96xf32>
    %166 = arith.divf %164, %165 : vector<8x96xf32>
    %167 = vector.extract_strided_slice %160 {offsets = [0, 96], sizes = [8, 32], strides = [1, 1]} : vector<8x128xf32> to vector<8x32xf32>
    %168 = math.tanh %167 : vector<8x32xf32>
    %169 = vector.extract_strided_slice %166 {offsets = [0, 32], sizes = [8, 32], strides = [1, 1]} : vector<8x96xf32> to vector<8x32xf32>
    %170 = arith.mulf %169, %146 : vector<8x32xf32>
    %171 = vector.extract_strided_slice %166 {offsets = [0, 0], sizes = [8, 32], strides = [1, 1]} : vector<8x96xf32> to vector<8x32xf32>
    %172 = arith.mulf %171, %168 : vector<8x32xf32>
    %173 = arith.addf %170, %172 : vector<8x32xf32>
    %174 = vector.extract_strided_slice %166 {offsets = [0, 64], sizes = [8, 32], strides = [1, 1]} : vector<8x96xf32> to vector<8x32xf32>
    %175 = math.tanh %173 : vector<8x32xf32>
    %176 = arith.mulf %174, %175 : vector<8x32xf32>
    %cst_49 = arith.constant dense<0.000000e+00> : vector<8x128xf32>
    %177 = tpu.matmul %149, %2, %cst_49 {dimension_numbers = #tpu.dot_dimension_numbers<[1], [0], [0], [1], [0, 0, 1, 1], [], []>} : vector<8x32xf32>, vector<32x128xf32>, vector<8x128xf32> -> vector<8x128xf32>
    %178 = arith.addf %158, %177 : vector<8x128xf32>
    %179 = vector.extract_strided_slice %178 {offsets = [0, 0], sizes = [8, 96], strides = [1, 1]} : vector<8x128xf32> to vector<8x96xf32>
    %180 = arith.negf %179 : vector<8x96xf32>
    %181 = math.exp %180 : vector<8x96xf32>
    %cst_50 = arith.constant 1.000000e+00 : f32
    %182 = vector.broadcast %cst_50 : f32 to vector<8x96xf32>
    %183 = arith.addf %182, %181 : vector<8x96xf32>
    %184 = arith.divf %182, %183 : vector<8x96xf32>
    %185 = vector.extract_strided_slice %178 {offsets = [0, 96], sizes = [8, 32], strides = [1, 1]} : vector<8x128xf32> to vector<8x32xf32>
    %186 = math.tanh %185 : vector<8x32xf32>
    %187 = vector.extract_strided_slice %184 {offsets = [0, 32], sizes = [8, 32], strides = [1, 1]} : vector<8x96xf32> to vector<8x32xf32>
    %188 = arith.mulf %187, %152 : vector<8x32xf32>
    %189 = vector.extract_strided_slice %184 {offsets = [0, 0], sizes = [8, 32], strides = [1, 1]} : vector<8x96xf32> to vector<8x32xf32>
    %190 = arith.mulf %189, %186 : vector<8x32xf32>
    %191 = arith.addf %188, %190 : vector<8x32xf32>
    %192 = vector.extract_strided_slice %184 {offsets = [0, 64], sizes = [8, 32], strides = [1, 1]} : vector<8x96xf32> to vector<8x32xf32>
    %193 = math.tanh %191 : vector<8x32xf32>
    %194 = arith.mulf %192, %193 : vector<8x32xf32>
    %cst_51 = arith.constant 0.000000e+00 : f32
    %195 = vector.shape_cast %154 : vector<8x1xi1> to vector<8x1xi1>
    %196 = vector.broadcast %195 : vector<8x1xi1> to vector<8x32xi1>
    %197 = vector.broadcast %cst_51 : f32 to vector<8x32xf32>
    %198 = arith.select %196, %176, %197 : vector<8x32xi1>, vector<8x32xf32>
    %c0_52 = arith.constant 0 : index
    %c2 = arith.constant 2 : index
    %c0_53 = arith.constant 0 : index
    %c0_54 = arith.constant 0 : index
    %199 = vector.load %arg7[%c0_52, %c2, %c0_53, %c0_54] : memref<2x8x8x32xf32, #tpu.memory_space<vmem>>, vector<1x1x8x32xf32>
    %200 = vector.shape_cast %199 : vector<1x1x8x32xf32> to vector<8x32xf32>
    %201 = vector.shape_cast %198 : vector<8x32xf32> to vector<1x1x8x32xf32>
    tpu.vector_store %arg7[%c0_52, %c2, %c0_53, %c0_54], %201 {strides = array<i32>} : memref<2x8x8x32xf32, #tpu.memory_space<vmem>>, vector<1x1x8x32xf32>,
    %cst_55 = arith.constant 0.000000e+00 : f32
    %202 = vector.shape_cast %156 : vector<8x1xi1> to vector<8x1xi1>
    %203 = vector.broadcast %202 : vector<8x1xi1> to vector<8x32xi1>
    %204 = vector.broadcast %cst_55 : f32 to vector<8x32xf32>
    %205 = arith.select %203, %194, %204 : vector<8x32xi1>, vector<8x32xf32>
    %c1_56 = arith.constant 1 : index
    %c5 = arith.constant 5 : index
    %c0_57 = arith.constant 0 : index
    %c0_58 = arith.constant 0 : index
    %206 = vector.load %arg7[%c1_56, %c5, %c0_57, %c0_58] : memref<2x8x8x32xf32, #tpu.memory_space<vmem>>, vector<1x1x8x32xf32>
    %207 = vector.shape_cast %206 : vector<1x1x8x32xf32> to vector<8x32xf32>
    %208 = vector.shape_cast %205 : vector<8x32xf32> to vector<1x1x8x32xf32>
    tpu.vector_store %arg7[%c1_56, %c5, %c0_57, %c0_58], %208 {strides = array<i32>} : memref<2x8x8x32xf32, #tpu.memory_space<vmem>>, vector<1x1x8x32xf32>,
    %209 = vector.shape_cast %154 : vector<8x1xi1> to vector<8x1xi1>
    %210 = vector.broadcast %209 : vector<8x1xi1> to vector<8x32xi1>
    %211 = arith.select %210, %176, %143 : vector<8x32xi1>, vector<8x32xf32>
    %212 = vector.shape_cast %154 : vector<8x1xi1> to vector<8x1xi1>
    %213 = vector.broadcast %212 : vector<8x1xi1> to vector<8x32xi1>
    %214 = arith.select %213, %173, %146 : vector<8x32xi1>, vector<8x32xf32>
    %215 = vector.shape_cast %156 : vector<8x1xi1> to vector<8x1xi1>
    %216 = vector.broadcast %215 : vector<8x1xi1> to vector<8x32xi1>
    %217 = arith.select %216, %194, %149 : vector<8x32xi1>, vector<8x32xf32>
    %218 = vector.shape_cast %156 : vector<8x1xi1> to vector<8x1xi1>
    %219 = vector.broadcast %218 : vector<8x1xi1> to vector<8x32xi1>
    %220 = arith.select %219, %191, %152 : vector<8x32xi1>, vector<8x32xf32>
    %221 = vector.extract_strided_slice %16 {offsets = [3, 0, 0], sizes = [1, 8, 1], strides = [1, 1, 1]} : vector<8x8x1xi1> to vector<1x8x1xi1>
    %222 = vector.shape_cast %221 : vector<1x8x1xi1> to vector<8x1xi1>
    %223 = vector.extract_strided_slice %16 {offsets = [4, 0, 0], sizes = [1, 8, 1], strides = [1, 1, 1]} : vector<8x8x1xi1> to vector<1x8x1xi1>
    %224 = vector.shape_cast %223 : vector<1x8x1xi1> to vector<8x1xi1>
    %c24 = arith.constant 24 : index
    %c0_59 = arith.constant 0 : index
    %225 = vector.load %arg8[%c24, %c0_59] : memref<64x256xf32, #tpu.memory_space<vmem>>, vector<8x128xf32>
    %c32 = arith.constant 32 : index
    %c128_60 = arith.constant 128 : index
    %226 = vector.load %arg8[%c32, %c128_60] : memref<64x256xf32, #tpu.memory_space<vmem>>, vector<8x128xf32>
    %cst_61 = arith.constant dense<0.000000e+00> : vector<8x128xf32>
    %227 = tpu.matmul %211, %1, %cst_61 {dimension_numbers = #tpu.dot_dimension_numbers<[1], [0], [0], [1], [0, 0, 1, 1], [], []>} : vector<8x32xf32>, vector<32x128xf32>, vector<8x128xf32> -> vector<8x128xf32>
    %228 = arith.addf %225, %227 : vector<8x128xf32>
    %229 = vector.extract_strided_slice %228 {offsets = [0, 0], sizes = [8, 96], strides = [1, 1]} : vector<8x128xf32> to vector<8x96xf32>
    %230 = arith.negf %229 : vector<8x96xf32>
    %231 = math.exp %230 : vector<8x96xf32>
    %cst_62 = arith.constant 1.000000e+00 : f32
    %232 = vector.broadcast %cst_62 : f32 to vector<8x96xf32>
    %233 = arith.addf %232, %231 : vector<8x96xf32>
    %234 = arith.divf %232, %233 : vector<8x96xf32>
    %235 = vector.extract_strided_slice %228 {offsets = [0, 96], sizes = [8, 32], strides = [1, 1]} : vector<8x128xf32> to vector<8x32xf32>
    %236 = math.tanh %235 : vector<8x32xf32>
    %237 = vector.extract_strided_slice %234 {offsets = [0, 32], sizes = [8, 32], strides = [1, 1]} : vector<8x96xf32> to vector<8x32xf32>
    %238 = arith.mulf %237, %214 : vector<8x32xf32>
    %239 = vector.extract_strided_slice %234 {offsets = [0, 0], sizes = [8, 32], strides = [1, 1]} : vector<8x96xf32> to vector<8x32xf32>
    %240 = arith.mulf %239, %236 : vector<8x32xf32>
    %241 = arith.addf %238, %240 : vector<8x32xf32>
    %242 = vector.extract_strided_slice %234 {offsets = [0, 64], sizes = [8, 32], strides = [1, 1]} : vector<8x96xf32> to vector<8x32xf32>
    %243 = math.tanh %241 : vector<8x32xf32>
    %244 = arith.mulf %242, %243 : vector<8x32xf32>
    %cst_63 = arith.constant dense<0.000000e+00> : vector<8x128xf32>
    %245 = tpu.matmul %217, %2, %cst_63 {dimension_numbers = #tpu.dot_dimension_numbers<[1], [0], [0], [1], [0, 0, 1, 1], [], []>} : vector<8x32xf32>, vector<32x128xf32>, vector<8x128xf32> -> vector<8x128xf32>
    %246 = arith.addf %226, %245 : vector<8x128xf32>
    %247 = vector.extract_strided_slice %246 {offsets = [0, 0], sizes = [8, 96], strides = [1, 1]} : vector<8x128xf32> to vector<8x96xf32>
    %248 = arith.negf %247 : vector<8x96xf32>
    %249 = math.exp %248 : vector<8x96xf32>
    %cst_64 = arith.constant 1.000000e+00 : f32
    %250 = vector.broadcast %cst_64 : f32 to vector<8x96xf32>
    %251 = arith.addf %250, %249 : vector<8x96xf32>
    %252 = arith.divf %250, %251 : vector<8x96xf32>
    %253 = vector.extract_strided_slice %246 {offsets = [0, 96], sizes = [8, 32], strides = [1, 1]} : vector<8x128xf32> to vector<8x32xf32>
    %254 = math.tanh %253 : vector<8x32xf32>
    %255 = vector.extract_strided_slice %252 {offsets = [0, 32], sizes = [8, 32], strides = [1, 1]} : vector<8x96xf32> to vector<8x32xf32>
    %256 = arith.mulf %255, %220 : vector<8x32xf32>
    %257 = vector.extract_strided_slice %252 {offsets = [0, 0], sizes = [8, 32], strides = [1, 1]} : vector<8x96xf32> to vector<8x32xf32>
    %258 = arith.mulf %257, %254 : vector<8x32xf32>
    %259 = arith.addf %256, %258 : vector<8x32xf32>
    %260 = vector.extract_strided_slice %252 {offsets = [0, 64], sizes = [8, 32], strides = [1, 1]} : vector<8x96xf32> to vector<8x32xf32>
    %261 = math.tanh %259 : vector<8x32xf32>
    %262 = arith.mulf %260, %261 : vector<8x32xf32>
    %cst_65 = arith.constant 0.000000e+00 : f32
    %263 = vector.shape_cast %222 : vector<8x1xi1> to vector<8x1xi1>
    %264 = vector.broadcast %263 : vector<8x1xi1> to vector<8x32xi1>
    %265 = vector.broadcast %cst_65 : f32 to vector<8x32xf32>
    %266 = arith.select %264, %244, %265 : vector<8x32xi1>, vector<8x32xf32>
    %c0_66 = arith.constant 0 : index
    %c3 = arith.constant 3 : index
    %c0_67 = arith.constant 0 : index
    %c0_68 = arith.constant 0 : index
    %267 = vector.load %arg7[%c0_66, %c3, %c0_67, %c0_68] : memref<2x8x8x32xf32, #tpu.memory_space<vmem>>, vector<1x1x8x32xf32>
    %268 = vector.shape_cast %267 : vector<1x1x8x32xf32> to vector<8x32xf32>
    %269 = vector.shape_cast %266 : vector<8x32xf32> to vector<1x1x8x32xf32>
    tpu.vector_store %arg7[%c0_66, %c3, %c0_67, %c0_68], %269 {strides = array<i32>} : memref<2x8x8x32xf32, #tpu.memory_space<vmem>>, vector<1x1x8x32xf32>,
    %cst_69 = arith.constant 0.000000e+00 : f32
    %270 = vector.shape_cast %224 : vector<8x1xi1> to vector<8x1xi1>
    %271 = vector.broadcast %270 : vector<8x1xi1> to vector<8x32xi1>
    %272 = vector.broadcast %cst_69 : f32 to vector<8x32xf32>
    %273 = arith.select %271, %262, %272 : vector<8x32xi1>, vector<8x32xf32>
    %c1_70 = arith.constant 1 : index
    %c4 = arith.constant 4 : index
    %c0_71 = arith.constant 0 : index
    %c0_72 = arith.constant 0 : index
    %274 = vector.load %arg7[%c1_70, %c4, %c0_71, %c0_72] : memref<2x8x8x32xf32, #tpu.memory_space<vmem>>, vector<1x1x8x32xf32>
    %275 = vector.shape_cast %274 : vector<1x1x8x32xf32> to vector<8x32xf32>
    %276 = vector.shape_cast %273 : vector<8x32xf32> to vector<1x1x8x32xf32>
    tpu.vector_store %arg7[%c1_70, %c4, %c0_71, %c0_72], %276 {strides = array<i32>} : memref<2x8x8x32xf32, #tpu.memory_space<vmem>>, vector<1x1x8x32xf32>,
    %277 = vector.shape_cast %222 : vector<8x1xi1> to vector<8x1xi1>
    %278 = vector.broadcast %277 : vector<8x1xi1> to vector<8x32xi1>
    %279 = arith.select %278, %244, %211 : vector<8x32xi1>, vector<8x32xf32>
    %280 = vector.shape_cast %222 : vector<8x1xi1> to vector<8x1xi1>
    %281 = vector.broadcast %280 : vector<8x1xi1> to vector<8x32xi1>
    %282 = arith.select %281, %241, %214 : vector<8x32xi1>, vector<8x32xf32>
    %283 = vector.shape_cast %224 : vector<8x1xi1> to vector<8x1xi1>
    %284 = vector.broadcast %283 : vector<8x1xi1> to vector<8x32xi1>
    %285 = arith.select %284, %262, %217 : vector<8x32xi1>, vector<8x32xf32>
    %286 = vector.shape_cast %224 : vector<8x1xi1> to vector<8x1xi1>
    %287 = vector.broadcast %286 : vector<8x1xi1> to vector<8x32xi1>
    %288 = arith.select %287, %259, %220 : vector<8x32xi1>, vector<8x32xf32>
    %289 = vector.extract_strided_slice %16 {offsets = [4, 0, 0], sizes = [1, 8, 1], strides = [1, 1, 1]} : vector<8x8x1xi1> to vector<1x8x1xi1>
    %290 = vector.shape_cast %289 : vector<1x8x1xi1> to vector<8x1xi1>
    %291 = vector.extract_strided_slice %16 {offsets = [3, 0, 0], sizes = [1, 8, 1], strides = [1, 1, 1]} : vector<8x8x1xi1> to vector<1x8x1xi1>
    %292 = vector.shape_cast %291 : vector<1x8x1xi1> to vector<8x1xi1>
    %c32_73 = arith.constant 32 : index
    %c0_74 = arith.constant 0 : index
    %293 = vector.load %arg8[%c32_73, %c0_74] : memref<64x256xf32, #tpu.memory_space<vmem>>, vector<8x128xf32>
    %c24_75 = arith.constant 24 : index
    %c128_76 = arith.constant 128 : index
    %294 = vector.load %arg8[%c24_75, %c128_76] : memref<64x256xf32, #tpu.memory_space<vmem>>, vector<8x128xf32>
    %cst_77 = arith.constant dense<0.000000e+00> : vector<8x128xf32>
    %295 = tpu.matmul %279, %1, %cst_77 {dimension_numbers = #tpu.dot_dimension_numbers<[1], [0], [0], [1], [0, 0, 1, 1], [], []>} : vector<8x32xf32>, vector<32x128xf32>, vector<8x128xf32> -> vector<8x128xf32>
    %296 = arith.addf %293, %295 : vector<8x128xf32>
    %297 = vector.extract_strided_slice %296 {offsets = [0, 0], sizes = [8, 96], strides = [1, 1]} : vector<8x128xf32> to vector<8x96xf32>
    %298 = arith.negf %297 : vector<8x96xf32>
    %299 = math.exp %298 : vector<8x96xf32>
    %cst_78 = arith.constant 1.000000e+00 : f32
    %300 = vector.broadcast %cst_78 : f32 to vector<8x96xf32>
    %301 = arith.addf %300, %299 : vector<8x96xf32>
    %302 = arith.divf %300, %301 : vector<8x96xf32>
    %303 = vector.extract_strided_slice %296 {offsets = [0, 96], sizes = [8, 32], strides = [1, 1]} : vector<8x128xf32> to vector<8x32xf32>
    %304 = math.tanh %303 : vector<8x32xf32>
    %305 = vector.extract_strided_slice %302 {offsets = [0, 32], sizes = [8, 32], strides = [1, 1]} : vector<8x96xf32> to vector<8x32xf32>
    %306 = arith.mulf %305, %282 : vector<8x32xf32>
    %307 = vector.extract_strided_slice %302 {offsets = [0, 0], sizes = [8, 32], strides = [1, 1]} : vector<8x96xf32> to vector<8x32xf32>
    %308 = arith.mulf %307, %304 : vector<8x32xf32>
    %309 = arith.addf %306, %308 : vector<8x32xf32>
    %310 = vector.extract_strided_slice %302 {offsets = [0, 64], sizes = [8, 32], strides = [1, 1]} : vector<8x96xf32> to vector<8x32xf32>
    %311 = math.tanh %309 : vector<8x32xf32>
    %312 = arith.mulf %310, %311 : vector<8x32xf32>
    %cst_79 = arith.constant dense<0.000000e+00> : vector<8x128xf32>
    %313 = tpu.matmul %285, %2, %cst_79 {dimension_numbers = #tpu.dot_dimension_numbers<[1], [0], [0], [1], [0, 0, 1, 1], [], []>} : vector<8x32xf32>, vector<32x128xf32>, vector<8x128xf32> -> vector<8x128xf32>
    %314 = arith.addf %294, %313 : vector<8x128xf32>
    %315 = vector.extract_strided_slice %314 {offsets = [0, 0], sizes = [8, 96], strides = [1, 1]} : vector<8x128xf32> to vector<8x96xf32>
    %316 = arith.negf %315 : vector<8x96xf32>
    %317 = math.exp %316 : vector<8x96xf32>
    %cst_80 = arith.constant 1.000000e+00 : f32
    %318 = vector.broadcast %cst_80 : f32 to vector<8x96xf32>
    %319 = arith.addf %318, %317 : vector<8x96xf32>
    %320 = arith.divf %318, %319 : vector<8x96xf32>
    %321 = vector.extract_strided_slice %314 {offsets = [0, 96], sizes = [8, 32], strides = [1, 1]} : vector<8x128xf32> to vector<8x32xf32>
    %322 = math.tanh %321 : vector<8x32xf32>
    %323 = vector.extract_strided_slice %320 {offsets = [0, 32], sizes = [8, 32], strides = [1, 1]} : vector<8x96xf32> to vector<8x32xf32>
    %324 = arith.mulf %323, %288 : vector<8x32xf32>
    %325 = vector.extract_strided_slice %320 {offsets = [0, 0], sizes = [8, 32], strides = [1, 1]} : vector<8x96xf32> to vector<8x32xf32>
    %326 = arith.mulf %325, %322 : vector<8x32xf32>
    %327 = arith.addf %324, %326 : vector<8x32xf32>
    %328 = vector.extract_strided_slice %320 {offsets = [0, 64], sizes = [8, 32], strides = [1, 1]} : vector<8x96xf32> to vector<8x32xf32>
    %329 = math.tanh %327 : vector<8x32xf32>
    %330 = arith.mulf %328, %329 : vector<8x32xf32>
    %cst_81 = arith.constant 0.000000e+00 : f32
    %331 = vector.shape_cast %290 : vector<8x1xi1> to vector<8x1xi1>
    %332 = vector.broadcast %331 : vector<8x1xi1> to vector<8x32xi1>
    %333 = vector.broadcast %cst_81 : f32 to vector<8x32xf32>
    %334 = arith.select %332, %312, %333 : vector<8x32xi1>, vector<8x32xf32>
    %c0_82 = arith.constant 0 : index
    %c4_83 = arith.constant 4 : index
    %c0_84 = arith.constant 0 : index
    %c0_85 = arith.constant 0 : index
    %335 = vector.load %arg7[%c0_82, %c4_83, %c0_84, %c0_85] : memref<2x8x8x32xf32, #tpu.memory_space<vmem>>, vector<1x1x8x32xf32>
    %336 = vector.shape_cast %335 : vector<1x1x8x32xf32> to vector<8x32xf32>
    %337 = vector.shape_cast %334 : vector<8x32xf32> to vector<1x1x8x32xf32>
    tpu.vector_store %arg7[%c0_82, %c4_83, %c0_84, %c0_85], %337 {strides = array<i32>} : memref<2x8x8x32xf32, #tpu.memory_space<vmem>>, vector<1x1x8x32xf32>,
    %cst_86 = arith.constant 0.000000e+00 : f32
    %338 = vector.shape_cast %292 : vector<8x1xi1> to vector<8x1xi1>
    %339 = vector.broadcast %338 : vector<8x1xi1> to vector<8x32xi1>
    %340 = vector.broadcast %cst_86 : f32 to vector<8x32xf32>
    %341 = arith.select %339, %330, %340 : vector<8x32xi1>, vector<8x32xf32>
    %c1_87 = arith.constant 1 : index
    %c3_88 = arith.constant 3 : index
    %c0_89 = arith.constant 0 : index
    %c0_90 = arith.constant 0 : index
    %342 = vector.load %arg7[%c1_87, %c3_88, %c0_89, %c0_90] : memref<2x8x8x32xf32, #tpu.memory_space<vmem>>, vector<1x1x8x32xf32>
    %343 = vector.shape_cast %342 : vector<1x1x8x32xf32> to vector<8x32xf32>
    %344 = vector.shape_cast %341 : vector<8x32xf32> to vector<1x1x8x32xf32>
    tpu.vector_store %arg7[%c1_87, %c3_88, %c0_89, %c0_90], %344 {strides = array<i32>} : memref<2x8x8x32xf32, #tpu.memory_space<vmem>>, vector<1x1x8x32xf32>,
    %345 = vector.shape_cast %290 : vector<8x1xi1> to vector<8x1xi1>
    %346 = vector.broadcast %345 : vector<8x1xi1> to vector<8x32xi1>
    %347 = arith.select %346, %312, %279 : vector<8x32xi1>, vector<8x32xf32>
    %348 = vector.shape_cast %290 : vector<8x1xi1> to vector<8x1xi1>
    %349 = vector.broadcast %348 : vector<8x1xi1> to vector<8x32xi1>
    %350 = arith.select %349, %309, %282 : vector<8x32xi1>, vector<8x32xf32>
    %351 = vector.shape_cast %292 : vector<8x1xi1> to vector<8x1xi1>
    %352 = vector.broadcast %351 : vector<8x1xi1> to vector<8x32xi1>
    %353 = arith.select %352, %330, %285 : vector<8x32xi1>, vector<8x32xf32>
    %354 = vector.shape_cast %292 : vector<8x1xi1> to vector<8x1xi1>
    %355 = vector.broadcast %354 : vector<8x1xi1> to vector<8x32xi1>
    %356 = arith.select %355, %327, %288 : vector<8x32xi1>, vector<8x32xf32>
    %357 = vector.extract_strided_slice %16 {offsets = [5, 0, 0], sizes = [1, 8, 1], strides = [1, 1, 1]} : vector<8x8x1xi1> to vector<1x8x1xi1>
    %358 = vector.shape_cast %357 : vector<1x8x1xi1> to vector<8x1xi1>
    %359 = vector.extract_strided_slice %16 {offsets = [2, 0, 0], sizes = [1, 8, 1], strides = [1, 1, 1]} : vector<8x8x1xi1> to vector<1x8x1xi1>
    %360 = vector.shape_cast %359 : vector<1x8x1xi1> to vector<8x1xi1>
    %c40_91 = arith.constant 40 : index
    %c0_92 = arith.constant 0 : index
    %361 = vector.load %arg8[%c40_91, %c0_92] : memref<64x256xf32, #tpu.memory_space<vmem>>, vector<8x128xf32>
    %c16_93 = arith.constant 16 : index
    %c128_94 = arith.constant 128 : index
    %362 = vector.load %arg8[%c16_93, %c128_94] : memref<64x256xf32, #tpu.memory_space<vmem>>, vector<8x128xf32>
    %cst_95 = arith.constant dense<0.000000e+00> : vector<8x128xf32>
    %363 = tpu.matmul %347, %1, %cst_95 {dimension_numbers = #tpu.dot_dimension_numbers<[1], [0], [0], [1], [0, 0, 1, 1], [], []>} : vector<8x32xf32>, vector<32x128xf32>, vector<8x128xf32> -> vector<8x128xf32>
    %364 = arith.addf %361, %363 : vector<8x128xf32>
    %365 = vector.extract_strided_slice %364 {offsets = [0, 0], sizes = [8, 96], strides = [1, 1]} : vector<8x128xf32> to vector<8x96xf32>
    %366 = arith.negf %365 : vector<8x96xf32>
    %367 = math.exp %366 : vector<8x96xf32>
    %cst_96 = arith.constant 1.000000e+00 : f32
    %368 = vector.broadcast %cst_96 : f32 to vector<8x96xf32>
    %369 = arith.addf %368, %367 : vector<8x96xf32>
    %370 = arith.divf %368, %369 : vector<8x96xf32>
    %371 = vector.extract_strided_slice %364 {offsets = [0, 96], sizes = [8, 32], strides = [1, 1]} : vector<8x128xf32> to vector<8x32xf32>
    %372 = math.tanh %371 : vector<8x32xf32>
    %373 = vector.extract_strided_slice %370 {offsets = [0, 32], sizes = [8, 32], strides = [1, 1]} : vector<8x96xf32> to vector<8x32xf32>
    %374 = arith.mulf %373, %350 : vector<8x32xf32>
    %375 = vector.extract_strided_slice %370 {offsets = [0, 0], sizes = [8, 32], strides = [1, 1]} : vector<8x96xf32> to vector<8x32xf32>
    %376 = arith.mulf %375, %372 : vector<8x32xf32>
    %377 = arith.addf %374, %376 : vector<8x32xf32>
    %378 = vector.extract_strided_slice %370 {offsets = [0, 64], sizes = [8, 32], strides = [1, 1]} : vector<8x96xf32> to vector<8x32xf32>
    %379 = math.tanh %377 : vector<8x32xf32>
    %380 = arith.mulf %378, %379 : vector<8x32xf32>
    %cst_97 = arith.constant dense<0.000000e+00> : vector<8x128xf32>
    %381 = tpu.matmul %353, %2, %cst_97 {dimension_numbers = #tpu.dot_dimension_numbers<[1], [0], [0], [1], [0, 0, 1, 1], [], []>} : vector<8x32xf32>, vector<32x128xf32>, vector<8x128xf32> -> vector<8x128xf32>
    %382 = arith.addf %362, %381 : vector<8x128xf32>
    %383 = vector.extract_strided_slice %382 {offsets = [0, 0], sizes = [8, 96], strides = [1, 1]} : vector<8x128xf32> to vector<8x96xf32>
    %384 = arith.negf %383 : vector<8x96xf32>
    %385 = math.exp %384 : vector<8x96xf32>
    %cst_98 = arith.constant 1.000000e+00 : f32
    %386 = vector.broadcast %cst_98 : f32 to vector<8x96xf32>
    %387 = arith.addf %386, %385 : vector<8x96xf32>
    %388 = arith.divf %386, %387 : vector<8x96xf32>
    %389 = vector.extract_strided_slice %382 {offsets = [0, 96], sizes = [8, 32], strides = [1, 1]} : vector<8x128xf32> to vector<8x32xf32>
    %390 = math.tanh %389 : vector<8x32xf32>
    %391 = vector.extract_strided_slice %388 {offsets = [0, 32], sizes = [8, 32], strides = [1, 1]} : vector<8x96xf32> to vector<8x32xf32>
    %392 = arith.mulf %391, %356 : vector<8x32xf32>
    %393 = vector.extract_strided_slice %388 {offsets = [0, 0], sizes = [8, 32], strides = [1, 1]} : vector<8x96xf32> to vector<8x32xf32>
    %394 = arith.mulf %393, %390 : vector<8x32xf32>
    %395 = arith.addf %392, %394 : vector<8x32xf32>
    %396 = vector.extract_strided_slice %388 {offsets = [0, 64], sizes = [8, 32], strides = [1, 1]} : vector<8x96xf32> to vector<8x32xf32>
    %397 = math.tanh %395 : vector<8x32xf32>
    %398 = arith.mulf %396, %397 : vector<8x32xf32>
    %cst_99 = arith.constant 0.000000e+00 : f32
    %399 = vector.shape_cast %358 : vector<8x1xi1> to vector<8x1xi1>
    %400 = vector.broadcast %399 : vector<8x1xi1> to vector<8x32xi1>
    %401 = vector.broadcast %cst_99 : f32 to vector<8x32xf32>
    %402 = arith.select %400, %380, %401 : vector<8x32xi1>, vector<8x32xf32>
    %c0_100 = arith.constant 0 : index
    %c5_101 = arith.constant 5 : index
    %c0_102 = arith.constant 0 : index
    %c0_103 = arith.constant 0 : index
    %403 = vector.load %arg7[%c0_100, %c5_101, %c0_102, %c0_103] : memref<2x8x8x32xf32, #tpu.memory_space<vmem>>, vector<1x1x8x32xf32>
    %404 = vector.shape_cast %403 : vector<1x1x8x32xf32> to vector<8x32xf32>
    %405 = vector.shape_cast %402 : vector<8x32xf32> to vector<1x1x8x32xf32>
    tpu.vector_store %arg7[%c0_100, %c5_101, %c0_102, %c0_103], %405 {strides = array<i32>} : memref<2x8x8x32xf32, #tpu.memory_space<vmem>>, vector<1x1x8x32xf32>,
    %cst_104 = arith.constant 0.000000e+00 : f32
    %406 = vector.shape_cast %360 : vector<8x1xi1> to vector<8x1xi1>
    %407 = vector.broadcast %406 : vector<8x1xi1> to vector<8x32xi1>
    %408 = vector.broadcast %cst_104 : f32 to vector<8x32xf32>
    %409 = arith.select %407, %398, %408 : vector<8x32xi1>, vector<8x32xf32>
    %c1_105 = arith.constant 1 : index
    %c2_106 = arith.constant 2 : index
    %c0_107 = arith.constant 0 : index
    %c0_108 = arith.constant 0 : index
    %410 = vector.load %arg7[%c1_105, %c2_106, %c0_107, %c0_108] : memref<2x8x8x32xf32, #tpu.memory_space<vmem>>, vector<1x1x8x32xf32>
    %411 = vector.shape_cast %410 : vector<1x1x8x32xf32> to vector<8x32xf32>
    %412 = vector.shape_cast %409 : vector<8x32xf32> to vector<1x1x8x32xf32>
    tpu.vector_store %arg7[%c1_105, %c2_106, %c0_107, %c0_108], %412 {strides = array<i32>} : memref<2x8x8x32xf32, #tpu.memory_space<vmem>>, vector<1x1x8x32xf32>,
    %413 = vector.shape_cast %358 : vector<8x1xi1> to vector<8x1xi1>
    %414 = vector.broadcast %413 : vector<8x1xi1> to vector<8x32xi1>
    %415 = arith.select %414, %380, %347 : vector<8x32xi1>, vector<8x32xf32>
    %416 = vector.shape_cast %358 : vector<8x1xi1> to vector<8x1xi1>
    %417 = vector.broadcast %416 : vector<8x1xi1> to vector<8x32xi1>
    %418 = arith.select %417, %377, %350 : vector<8x32xi1>, vector<8x32xf32>
    %419 = vector.shape_cast %360 : vector<8x1xi1> to vector<8x1xi1>
    %420 = vector.broadcast %419 : vector<8x1xi1> to vector<8x32xi1>
    %421 = arith.select %420, %398, %353 : vector<8x32xi1>, vector<8x32xf32>
    %422 = vector.shape_cast %360 : vector<8x1xi1> to vector<8x1xi1>
    %423 = vector.broadcast %422 : vector<8x1xi1> to vector<8x32xi1>
    %424 = arith.select %423, %395, %356 : vector<8x32xi1>, vector<8x32xf32>
    %425 = vector.extract_strided_slice %16 {offsets = [6, 0, 0], sizes = [1, 8, 1], strides = [1, 1, 1]} : vector<8x8x1xi1> to vector<1x8x1xi1>
    %426 = vector.shape_cast %425 : vector<1x8x1xi1> to vector<8x1xi1>
    %427 = vector.extract_strided_slice %16 {offsets = [1, 0, 0], sizes = [1, 8, 1], strides = [1, 1, 1]} : vector<8x8x1xi1> to vector<1x8x1xi1>
    %428 = vector.shape_cast %427 : vector<1x8x1xi1> to vector<8x1xi1>
    %c48_109 = arith.constant 48 : index
    %c0_110 = arith.constant 0 : index
    %429 = vector.load %arg8[%c48_109, %c0_110] : memref<64x256xf32, #tpu.memory_space<vmem>>, vector<8x128xf32>
    %c8_111 = arith.constant 8 : index
    %c128_112 = arith.constant 128 : index
    %430 = vector.load %arg8[%c8_111, %c128_112] : memref<64x256xf32, #tpu.memory_space<vmem>>, vector<8x128xf32>
    %cst_113 = arith.constant dense<0.000000e+00> : vector<8x128xf32>
    %431 = tpu.matmul %415, %1, %cst_113 {dimension_numbers = #tpu.dot_dimension_numbers<[1], [0], [0], [1], [0, 0, 1, 1], [], []>} : vector<8x32xf32>, vector<32x128xf32>, vector<8x128xf32> -> vector<8x128xf32>
    %432 = arith.addf %429, %431 : vector<8x128xf32>
    %433 = vector.extract_strided_slice %432 {offsets = [0, 0], sizes = [8, 96], strides = [1, 1]} : vector<8x128xf32> to vector<8x96xf32>
    %434 = arith.negf %433 : vector<8x96xf32>
    %435 = math.exp %434 : vector<8x96xf32>
    %cst_114 = arith.constant 1.000000e+00 : f32
    %436 = vector.broadcast %cst_114 : f32 to vector<8x96xf32>
    %437 = arith.addf %436, %435 : vector<8x96xf32>
    %438 = arith.divf %436, %437 : vector<8x96xf32>
    %439 = vector.extract_strided_slice %432 {offsets = [0, 96], sizes = [8, 32], strides = [1, 1]} : vector<8x128xf32> to vector<8x32xf32>
    %440 = math.tanh %439 : vector<8x32xf32>
    %441 = vector.extract_strided_slice %438 {offsets = [0, 32], sizes = [8, 32], strides = [1, 1]} : vector<8x96xf32> to vector<8x32xf32>
    %442 = arith.mulf %441, %418 : vector<8x32xf32>
    %443 = vector.extract_strided_slice %438 {offsets = [0, 0], sizes = [8, 32], strides = [1, 1]} : vector<8x96xf32> to vector<8x32xf32>
    %444 = arith.mulf %443, %440 : vector<8x32xf32>
    %445 = arith.addf %442, %444 : vector<8x32xf32>
    %446 = vector.extract_strided_slice %438 {offsets = [0, 64], sizes = [8, 32], strides = [1, 1]} : vector<8x96xf32> to vector<8x32xf32>
    %447 = math.tanh %445 : vector<8x32xf32>
    %448 = arith.mulf %446, %447 : vector<8x32xf32>
    %cst_115 = arith.constant dense<0.000000e+00> : vector<8x128xf32>
    %449 = tpu.matmul %421, %2, %cst_115 {dimension_numbers = #tpu.dot_dimension_numbers<[1], [0], [0], [1], [0, 0, 1, 1], [], []>} : vector<8x32xf32>, vector<32x128xf32>, vector<8x128xf32> -> vector<8x128xf32>
    %450 = arith.addf %430, %449 : vector<8x128xf32>
    %451 = vector.extract_strided_slice %450 {offsets = [0, 0], sizes = [8, 96], strides = [1, 1]} : vector<8x128xf32> to vector<8x96xf32>
    %452 = arith.negf %451 : vector<8x96xf32>
    %453 = math.exp %452 : vector<8x96xf32>
    %cst_116 = arith.constant 1.000000e+00 : f32
    %454 = vector.broadcast %cst_116 : f32 to vector<8x96xf32>
    %455 = arith.addf %454, %453 : vector<8x96xf32>
    %456 = arith.divf %454, %455 : vector<8x96xf32>
    %457 = vector.extract_strided_slice %450 {offsets = [0, 96], sizes = [8, 32], strides = [1, 1]} : vector<8x128xf32> to vector<8x32xf32>
    %458 = math.tanh %457 : vector<8x32xf32>
    %459 = vector.extract_strided_slice %456 {offsets = [0, 32], sizes = [8, 32], strides = [1, 1]} : vector<8x96xf32> to vector<8x32xf32>
    %460 = arith.mulf %459, %424 : vector<8x32xf32>
    %461 = vector.extract_strided_slice %456 {offsets = [0, 0], sizes = [8, 32], strides = [1, 1]} : vector<8x96xf32> to vector<8x32xf32>
    %462 = arith.mulf %461, %458 : vector<8x32xf32>
    %463 = arith.addf %460, %462 : vector<8x32xf32>
    %464 = vector.extract_strided_slice %456 {offsets = [0, 64], sizes = [8, 32], strides = [1, 1]} : vector<8x96xf32> to vector<8x32xf32>
    %465 = math.tanh %463 : vector<8x32xf32>
    %466 = arith.mulf %464, %465 : vector<8x32xf32>
    %cst_117 = arith.constant 0.000000e+00 : f32
    %467 = vector.shape_cast %426 : vector<8x1xi1> to vector<8x1xi1>
    %468 = vector.broadcast %467 : vector<8x1xi1> to vector<8x32xi1>
    %469 = vector.broadcast %cst_117 : f32 to vector<8x32xf32>
    %470 = arith.select %468, %448, %469 : vector<8x32xi1>, vector<8x32xf32>
    %c0_118 = arith.constant 0 : index
    %c6_119 = arith.constant 6 : index
    %c0_120 = arith.constant 0 : index
    %c0_121 = arith.constant 0 : index
    %471 = vector.load %arg7[%c0_118, %c6_119, %c0_120, %c0_121] : memref<2x8x8x32xf32, #tpu.memory_space<vmem>>, vector<1x1x8x32xf32>
    %472 = vector.shape_cast %471 : vector<1x1x8x32xf32> to vector<8x32xf32>
    %473 = vector.shape_cast %470 : vector<8x32xf32> to vector<1x1x8x32xf32>
    tpu.vector_store %arg7[%c0_118, %c6_119, %c0_120, %c0_121], %473 {strides = array<i32>} : memref<2x8x8x32xf32, #tpu.memory_space<vmem>>, vector<1x1x8x32xf32>,
    %cst_122 = arith.constant 0.000000e+00 : f32
    %474 = vector.shape_cast %428 : vector<8x1xi1> to vector<8x1xi1>
    %475 = vector.broadcast %474 : vector<8x1xi1> to vector<8x32xi1>
    %476 = vector.broadcast %cst_122 : f32 to vector<8x32xf32>
    %477 = arith.select %475, %466, %476 : vector<8x32xi1>, vector<8x32xf32>
    %c1_123 = arith.constant 1 : index
    %c1_124 = arith.constant 1 : index
    %c0_125 = arith.constant 0 : index
    %c0_126 = arith.constant 0 : index
    %478 = vector.load %arg7[%c1_123, %c1_124, %c0_125, %c0_126] : memref<2x8x8x32xf32, #tpu.memory_space<vmem>>, vector<1x1x8x32xf32>
    %479 = vector.shape_cast %478 : vector<1x1x8x32xf32> to vector<8x32xf32>
    %480 = vector.shape_cast %477 : vector<8x32xf32> to vector<1x1x8x32xf32>
    tpu.vector_store %arg7[%c1_123, %c1_124, %c0_125, %c0_126], %480 {strides = array<i32>} : memref<2x8x8x32xf32, #tpu.memory_space<vmem>>, vector<1x1x8x32xf32>,
    %481 = vector.shape_cast %426 : vector<8x1xi1> to vector<8x1xi1>
    %482 = vector.broadcast %481 : vector<8x1xi1> to vector<8x32xi1>
    %483 = arith.select %482, %448, %415 : vector<8x32xi1>, vector<8x32xf32>
    %484 = vector.shape_cast %426 : vector<8x1xi1> to vector<8x1xi1>
    %485 = vector.broadcast %484 : vector<8x1xi1> to vector<8x32xi1>
    %486 = arith.select %485, %445, %418 : vector<8x32xi1>, vector<8x32xf32>
    %487 = vector.shape_cast %428 : vector<8x1xi1> to vector<8x1xi1>
    %488 = vector.broadcast %487 : vector<8x1xi1> to vector<8x32xi1>
    %489 = arith.select %488, %466, %421 : vector<8x32xi1>, vector<8x32xf32>
    %490 = vector.shape_cast %428 : vector<8x1xi1> to vector<8x1xi1>
    %491 = vector.broadcast %490 : vector<8x1xi1> to vector<8x32xi1>
    %492 = arith.select %491, %463, %424 : vector<8x32xi1>, vector<8x32xf32>
    %493 = vector.extract_strided_slice %16 {offsets = [7, 0, 0], sizes = [1, 8, 1], strides = [1, 1, 1]} : vector<8x8x1xi1> to vector<1x8x1xi1>
    %494 = vector.shape_cast %493 : vector<1x8x1xi1> to vector<8x1xi1>
    %495 = vector.extract_strided_slice %16 {offsets = [0, 0, 0], sizes = [1, 8, 1], strides = [1, 1, 1]} : vector<8x8x1xi1> to vector<1x8x1xi1>
    %496 = vector.shape_cast %495 : vector<1x8x1xi1> to vector<8x1xi1>
    %c56_127 = arith.constant 56 : index
    %c0_128 = arith.constant 0 : index
    %497 = vector.load %arg8[%c56_127, %c0_128] : memref<64x256xf32, #tpu.memory_space<vmem>>, vector<8x128xf32>
    %c0_129 = arith.constant 0 : index
    %c128_130 = arith.constant 128 : index
    %498 = vector.load %arg8[%c0_129, %c128_130] : memref<64x256xf32, #tpu.memory_space<vmem>>, vector<8x128xf32>
    %cst_131 = arith.constant dense<0.000000e+00> : vector<8x128xf32>
    %499 = tpu.matmul %483, %1, %cst_131 {dimension_numbers = #tpu.dot_dimension_numbers<[1], [0], [0], [1], [0, 0, 1, 1], [], []>} : vector<8x32xf32>, vector<32x128xf32>, vector<8x128xf32> -> vector<8x128xf32>
    %500 = arith.addf %497, %499 : vector<8x128xf32>
    %501 = vector.extract_strided_slice %500 {offsets = [0, 0], sizes = [8, 96], strides = [1, 1]} : vector<8x128xf32> to vector<8x96xf32>
    %502 = arith.negf %501 : vector<8x96xf32>
    %503 = math.exp %502 : vector<8x96xf32>
    %cst_132 = arith.constant 1.000000e+00 : f32
    %504 = vector.broadcast %cst_132 : f32 to vector<8x96xf32>
    %505 = arith.addf %504, %503 : vector<8x96xf32>
    %506 = arith.divf %504, %505 : vector<8x96xf32>
    %507 = vector.extract_strided_slice %500 {offsets = [0, 96], sizes = [8, 32], strides = [1, 1]} : vector<8x128xf32> to vector<8x32xf32>
    %508 = math.tanh %507 : vector<8x32xf32>
    %509 = vector.extract_strided_slice %506 {offsets = [0, 32], sizes = [8, 32], strides = [1, 1]} : vector<8x96xf32> to vector<8x32xf32>
    %510 = arith.mulf %509, %486 : vector<8x32xf32>
    %511 = vector.extract_strided_slice %506 {offsets = [0, 0], sizes = [8, 32], strides = [1, 1]} : vector<8x96xf32> to vector<8x32xf32>
    %512 = arith.mulf %511, %508 : vector<8x32xf32>
    %513 = arith.addf %510, %512 : vector<8x32xf32>
    %514 = vector.extract_strided_slice %506 {offsets = [0, 64], sizes = [8, 32], strides = [1, 1]} : vector<8x96xf32> to vector<8x32xf32>
    %515 = math.tanh %513 : vector<8x32xf32>
    %516 = arith.mulf %514, %515 : vector<8x32xf32>
    %cst_133 = arith.constant dense<0.000000e+00> : vector<8x128xf32>
    %517 = tpu.matmul %489, %2, %cst_133 {dimension_numbers = #tpu.dot_dimension_numbers<[1], [0], [0], [1], [0, 0, 1, 1], [], []>} : vector<8x32xf32>, vector<32x128xf32>, vector<8x128xf32> -> vector<8x128xf32>
    %518 = arith.addf %498, %517 : vector<8x128xf32>
    %519 = vector.extract_strided_slice %518 {offsets = [0, 0], sizes = [8, 96], strides = [1, 1]} : vector<8x128xf32> to vector<8x96xf32>
    %520 = arith.negf %519 : vector<8x96xf32>
    %521 = math.exp %520 : vector<8x96xf32>
    %cst_134 = arith.constant 1.000000e+00 : f32
    %522 = vector.broadcast %cst_134 : f32 to vector<8x96xf32>
    %523 = arith.addf %522, %521 : vector<8x96xf32>
    %524 = arith.divf %522, %523 : vector<8x96xf32>
    %525 = vector.extract_strided_slice %518 {offsets = [0, 96], sizes = [8, 32], strides = [1, 1]} : vector<8x128xf32> to vector<8x32xf32>
    %526 = math.tanh %525 : vector<8x32xf32>
    %527 = vector.extract_strided_slice %524 {offsets = [0, 32], sizes = [8, 32], strides = [1, 1]} : vector<8x96xf32> to vector<8x32xf32>
    %528 = arith.mulf %527, %492 : vector<8x32xf32>
    %529 = vector.extract_strided_slice %524 {offsets = [0, 0], sizes = [8, 32], strides = [1, 1]} : vector<8x96xf32> to vector<8x32xf32>
    %530 = arith.mulf %529, %526 : vector<8x32xf32>
    %531 = arith.addf %528, %530 : vector<8x32xf32>
    %532 = vector.extract_strided_slice %524 {offsets = [0, 64], sizes = [8, 32], strides = [1, 1]} : vector<8x96xf32> to vector<8x32xf32>
    %533 = math.tanh %531 : vector<8x32xf32>
    %534 = arith.mulf %532, %533 : vector<8x32xf32>
    %cst_135 = arith.constant 0.000000e+00 : f32
    %535 = vector.shape_cast %494 : vector<8x1xi1> to vector<8x1xi1>
    %536 = vector.broadcast %535 : vector<8x1xi1> to vector<8x32xi1>
    %537 = vector.broadcast %cst_135 : f32 to vector<8x32xf32>
    %538 = arith.select %536, %516, %537 : vector<8x32xi1>, vector<8x32xf32>
    %c0_136 = arith.constant 0 : index
    %c7_137 = arith.constant 7 : index
    %c0_138 = arith.constant 0 : index
    %c0_139 = arith.constant 0 : index
    %539 = vector.load %arg7[%c0_136, %c7_137, %c0_138, %c0_139] : memref<2x8x8x32xf32, #tpu.memory_space<vmem>>, vector<1x1x8x32xf32>
    %540 = vector.shape_cast %539 : vector<1x1x8x32xf32> to vector<8x32xf32>
    %541 = vector.shape_cast %538 : vector<8x32xf32> to vector<1x1x8x32xf32>
    tpu.vector_store %arg7[%c0_136, %c7_137, %c0_138, %c0_139], %541 {strides = array<i32>} : memref<2x8x8x32xf32, #tpu.memory_space<vmem>>, vector<1x1x8x32xf32>,
    %cst_140 = arith.constant 0.000000e+00 : f32
    %542 = vector.shape_cast %496 : vector<8x1xi1> to vector<8x1xi1>
    %543 = vector.broadcast %542 : vector<8x1xi1> to vector<8x32xi1>
    %544 = vector.broadcast %cst_140 : f32 to vector<8x32xf32>
    %545 = arith.select %543, %534, %544 : vector<8x32xi1>, vector<8x32xf32>
    %c1_141 = arith.constant 1 : index
    %c0_142 = arith.constant 0 : index
    %c0_143 = arith.constant 0 : index
    %c0_144 = arith.constant 0 : index
    %546 = vector.load %arg7[%c1_141, %c0_142, %c0_143, %c0_144] : memref<2x8x8x32xf32, #tpu.memory_space<vmem>>, vector<1x1x8x32xf32>
    %547 = vector.shape_cast %546 : vector<1x1x8x32xf32> to vector<8x32xf32>
    %548 = vector.shape_cast %545 : vector<8x32xf32> to vector<1x1x8x32xf32>
    tpu.vector_store %arg7[%c1_141, %c0_142, %c0_143, %c0_144], %548 {strides = array<i32>} : memref<2x8x8x32xf32, #tpu.memory_space<vmem>>, vector<1x1x8x32xf32>,
    return
  }
  func.func @transform_0(%arg0: i32) -> (i32, i32, i32, i32) {
    %c0_i32 = arith.constant 0 : i32
    %c0_i32_0 = arith.constant 0 : i32
    %c0_i32_1 = arith.constant 0 : i32
    %c0_i32_2 = arith.constant 0 : i32
    return %c0_i32, %c0_i32_0, %arg0, %c0_i32_1 : i32, i32, i32, i32
  }
  func.func @transform_1(%arg0: i32) -> (i32, i32) {
    %c0_i32 = arith.constant 0 : i32
    %c0_i32_0 = arith.constant 0 : i32
    return %arg0, %c0_i32 : i32, i32
  }
  func.func @transform_2(%arg0: i32) -> (i32, i32) {
    %c0_i32 = arith.constant 0 : i32
    %c0_i32_0 = arith.constant 0 : i32
    %c0_i32_1 = arith.constant 0 : i32
    return %c0_i32, %c0_i32_0 : i32, i32
  }
  func.func @transform_3(%arg0: i32) -> (i32, i32) {
    %c0_i32 = arith.constant 0 : i32
    %c0_i32_0 = arith.constant 0 : i32
    %c0_i32_1 = arith.constant 0 : i32
    return %c0_i32, %c0_i32_0 : i32, i32
  }
  func.func @transform_4(%arg0: i32) -> (i32, i32) {
    %c0_i32 = arith.constant 0 : i32
    %c0_i32_0 = arith.constant 0 : i32
    %c0_i32_1 = arith.constant 0 : i32
    return %c0_i32, %c0_i32_0 : i32, i32
  }
  func.func @transform_5(%arg0: i32) -> (i32, i32) {
    %c0_i32 = arith.constant 0 : i32
    %c0_i32_0 = arith.constant 0 : i32
    %c0_i32_1 = arith.constant 0 : i32
    return %c0_i32, %c0_i32_0 : i32, i32
  }
  func.func @transform_6(%arg0: i32) -> (i32, i32, i32, i32) {
    %c0_i32 = arith.constant 0 : i32
    %c0_i32_0 = arith.constant 0 : i32
    %c0_i32_1 = arith.constant 0 : i32
    %c0_i32_2 = arith.constant 0 : i32
    return %c0_i32, %c0_i32_0, %arg0, %c0_i32_1 : i32, i32, i32, i32
  }
}

</mosaic_0001>

<bundles_post_ra>
// kernel: tpu_custom_call.1
= control target key start
LH: loop header
LB: loop body
LE: loop exit
PB: predicated region body
PF: predicated region fallthrough
CT: control target
= control target key end

     0   :  { %11 = vsyncpa [#allocation4], 0  ;;  %s3359_s0 = inlined_call_operand.hbm [shape: f32[1,8,8,16], index: 0, kind: input, shape index: {}]   ;;  %s3360_s1 = inlined_call_operand.vmem [shape: s32[8,1], index: 1, kind: input, shape index: {}]   ;;  %s3361_s2 = inlined_call_operand.hbm [shape: f32[16,256], index: 2, kind: input, shape index: {}]   ;;  %s3362_s3 = inlined_call_operand.hbm [shape: f32[32,128], index: 3, kind: input, shape index: {}]   ;;  %s3363_s4 = inlined_call_operand.hbm [shape: f32[32,128], index: 4, kind: input, shape index: {}]   ;;  %s3364_s5 = inlined_call_operand.vmem [shape: f32[1,256], index: 5, kind: input, shape index: {}]   ;;  %s3365_s6 = inlined_call_operand.hbm [shape: f32[2,8,8,32], index: 6, kind: output, shape index: {}]  }
   0x1   :  { %12 = vsyncpa [#allocation7], 0 }
   0x2   :  { %13 = vsyncpa [#allocation10], 0 }
   0x3   :  { %14 = vsyncpa [#allocation5], 0  ;;  %s2628_s21 = smov [#allocation6]  }
   0x4   :  { %s34_s22 = sshll.u32 %s2628_s21, 4  ;;  %s35_s22 = int_to_ptr.vmem [resolvable:$true] %s34_s22 }
   0x5   :  { %s2528_s23 = scalar_lea.vmem %s35_s22, 512  ;;  %p2533_p1 = scmp.lt.s32.totalorder %s35_s22, %s35_s22 }
   0x6   :  { %p2529_p0 = scmp.ne.s32.totalorder %s35_s22, %s2528_s23  ;;  %p2534_p2 = scmp.lt.s32.totalorder %s2528_s23, %s2528_s23 }
   0x8   :  { %p2535_p3 = por %p2534_p2, %p2533_p1 }
   0xa   :  { %p2536_p4 = pnand %p2535_p3, %p2529_p0 }
   0xc   :  { %2539 = shalt.err (!%p2536_p4)
}
   0xd   :  { %s2629_s24 = smov 256   ;;  %s2630_s25 = smov 16  }
   0xe   :  { %40 = dma.hbm_to_vmem [thread:$0]  %s3361_s2, 512, %s35_s22, [#allocation7], %s2629_s24, %s2629_s24, %s2630_s25  }
   0xf   :  { %s2631_s28 = smov [#allocation3]  }
  0x10   :  { %s20_s29 = sshll.u32 %s2631_s28, 4  ;;  %s21_s29 = int_to_ptr.vmem [resolvable:$true] %s20_s29 }
  0x11   :  { %s2548_s30 = scalar_lea.vmem %s21_s29, 1024  ;;  %p2553_p6 = scmp.lt.s32.totalorder %s21_s29, %s21_s29 }
  0x12   :  { %p2549_p5 = scmp.ne.s32.totalorder %s21_s29, %s2548_s30  ;;  %p2554_p7 = scmp.lt.s32.totalorder %s2548_s30, %s2548_s30 }
  0x14   :  { %p2555_p8 = por %p2554_p7, %p2553_p6 }
  0x16   :  { %p2556_p9 = pnand %p2555_p8, %p2549_p5 }
  0x18   :  { %2559 = shalt.err (!%p2556_p9)
}
  0x19   :  { %s2632_s7 = smov 128   ;;  %s2633_s8 = smov 8  }
  0x1a   :  { %26 = dma.hbm_to_vmem [thread:$0]  %s3359_s0, 1024, %s21_s29, [#allocation4], %s2632_s7, %s2632_s7, %s2633_s8  }
  0x1b   :  { %s2634_s2 = smov [#allocation8]   ;;  %s2635_s12 = smov [#allocation9]  }
  0x1c   :  { %s46_s11 = sshll.u32 %s2634_s2, 4  ;;  %s58_s13 = sshll.u32 %s2635_s12, 4  ;;  %s47_s11 = int_to_ptr.vmem [resolvable:$true] %s46_s11  ;;  %s59_s13 = int_to_ptr.vmem [resolvable:$true] %s58_s13 }
  0x1d   :  { %s2568_s14 = scalar_lea.vmem %s47_s11, 512  ;;  %p2573_p11 = scmp.lt.s32.totalorder %s47_s11, %s47_s11 }
  0x1e   :  { %p2569_p10 = scmp.ne.s32.totalorder %s47_s11, %s2568_s14  ;;  %p2574_p12 = scmp.lt.s32.totalorder %s2568_s14, %s2568_s14 }
  0x20   :  { %p2575_p13 = por %p2574_p12, %p2573_p11 }
  0x22   :  { %p2576_p0 = pnand %p2575_p13, %p2569_p10 }
  0x24   :  { %2579 = shalt.err (!%p2576_p0)
}
  0x25   :  { %52 = dma.hbm_to_vmem [thread:$0]  %s3362_s3, 512, %s47_s11, [#allocation7], %s2632_s7, %s2632_s7, %s2633_s8  }
  0x26   :  { %s2588_s0 = scalar_lea.vmem %s59_s13, 512  ;;  %p2593_p2 = scmp.lt.s32.totalorder %s59_s13, %s59_s13 }
  0x27   :  { %p2589_p1 = scmp.ne.s32.totalorder %s59_s13, %s2588_s0  ;;  %p2594_p3 = scmp.lt.s32.totalorder %s2588_s0, %s2588_s0 }
  0x29   :  { %p2595_p4 = por %p2594_p3, %p2593_p2 }
  0x2b   :  { %p2596_p5 = pnand %p2595_p4, %p2589_p1 }
  0x2d   :  { %2599 = shalt.err (!%p2596_p5)
}
  0x2e   :  { %64 = dma.hbm_to_vmem [thread:$0]  %s3363_s4, 512, %s59_s13, [#allocation10], %s2632_s7, %s2632_s7, %s2633_s8  }
  0x2f   :  { %2620 = dma.done.wait [#allocation4], 1024  }
  0x30   :  { %2621 = vsyncadd [#allocation4], 4294966272 }
  0x31   :  { %2622 = dma.done.wait [#allocation7], 1024  }
  0x32   :  { %2623 = vsyncadd [#allocation7], 4294966272 }
  0x33   :  { %2624 = dma.done.wait [#allocation10], 512  }
  0x34   :  { %2625 = vsyncadd [#allocation10], 4294966784  ;;  %v2636_v0 = vmov 0.0   ;;  %vm2637_vm0 = vmmov 0   ;;  %v99_v1 = vld [vmem:[#allocation6 + $0x18] sm:$0xff]  ;;  %v98_v3 = vld [vmem:[#allocation6 + $0x10] sm:$0xff]  ;;  %v102_v22 = vlaneseq }
  0x35   :  { %2192 = vmatprep.subr.mxu1 %v2636_v0  ;;  %201 = vmatprep.mubr.f32.mxu0 %v2636_v0  ;;  %v2702_v2 = vld [vmem:[#allocation8 + $0x18] sm:$0xff]  ;;  %v97_v4 = vld [vmem:[#allocation6 + $0x8] sm:$0xff]  ;;  %v2705_v5 = vld [vmem:[#allocation8 + $0x10] sm:$0xff]  ;;  %vm112_vm1 = vcmask 130048   ;;  %v2638_v21 = vmov 0   ;;  %vm276_vm6 = vcmask 261120  }
  0x36   :  { %2200 = vmatprep.mubr.msk.f32.mxu1 %vm2637_vm0, %v2636_v0  ;;  %165 = vmatprep.subr.mxu0 %v99_v1  ;;  %v96_v6 = vld [vmem:[#allocation6] sm:$0xff]  ;;  %v2708_v8 = vld [vmem:[#allocation8 + $0x8] sm:$0xff]  ;;  %v2718_v11 = vld [vmem:[#allocation9 + $0x18] sm:$0xff]  ;;  %v103_v23 = vshrl.u32 %v102_v22, 7  ;;  %s2641_s21 = smov [#allocation11]  }
  0x37   :  { %2193 = vmatpush3.msra.mxu1 %v2702_v2  ;;  %166 = vmatpush1.msra.mxu0 %v98_v3  ;;  %v88_v7 = vld [vmem:[#allocation3] sm:$0xff]  ;;  %v89_v10 = vld [vmem:[#allocation3 + $0x8] sm:$0xff]  ;;  %v2724_v12 = vld [vmem:[#allocation9 + $0x10] sm:$0xff]  ;;  %s2060_s22 = sshll.u32 %s2641_s21, 4  ;;  %s2061_s22 = int_to_ptr.vmem [resolvable:$true] %s2060_s22 }
  0x38   :  { %2194 = vmatprep.subr.mxu1 %v2636_v0  ;;  %167 = vmatprep.subr.mxu0 %v97_v4  ;;  %v2712_v9 = vld [vmem:[#allocation8] sm:$0xff]  ;;  %v90_v13 = vld [vmem:[#allocation3 + $0x10] sm:$0xff]  ;;  %v2730_v14 = vld [vmem:[#allocation9 + $0x8] sm:$0xff]  ;;  %v104_v24 = vsub.s32 0, %v103_v23  ;;  %v108_v26 = vsub.s32 1, %v103_v23  ;;  %s2600_s23 = scalar_lea.vmem %s2061_s22, 2048  ;;  %p2605_p7 = scmp.lt.s32.totalorder %s2061_s22, %s2061_s22 }
  0x39   :  { %2195 = vmatpush3.msra.mxu1 %v2705_v5  ;;  %168 = vmatpush1.msra.mxu0 %v96_v6  ;;  %v2736_v15 = vld [vmem:[#allocation9] sm:$0xff]  ;;  %v91_v16 = vld [vmem:[#allocation3 + $0x18] sm:$0xff]  ;;  %v93_v18 = vld [vmem:[#allocation3 + $0x28] sm:$0xff]  ;;  %p2601_p6 = scmp.ne.s32.totalorder %s2061_s22, %s2600_s23  ;;  %p2606_p8 = scmp.lt.s32.totalorder %s2600_s23, %s2600_s23 }
  0x3a   :  { %2196 = vmatprep.subr.mxu1 %v2636_v0  ;;  %2074 = vmatmul.mubr.msk.f32.vlgmr.msra.gmra.mxu0 %vm112_vm1, %v88_v7  ;;  %v92_v17 = vld [vmem:[#allocation3 + $0x20] sm:$0xff]  ;;  %v94_v19 = vld [vmem:[#allocation3 + $0x30] sm:$0xff]  ;;  %v95_v20 = vld [vmem:[#allocation3 + $0x38] sm:$0xff] }
  0x3b   :  { %2197 = vmatpush3.msra.mxu1 %v2708_v8  ;;  %207 = vmatprep.mubr.f32.mxu0 %v2636_v0  ;;  %v100_v25 = vld [vmem:[%s3364_s5] sm:$0x3]  ;;  %s2639_s5 = smov 32   ;;  %p2607_p9 = por %p2606_p8, %p2605_p7 }
  0x3c   :  { %2198 = vmatprep.subr.mxu1 %v2636_v0  ;;  %2236 = vmatprep.subr.mxu0 %v2636_v0  ;;  %v105_v27 = vrot.slane %v100_v25, %v104_v24  ;;  %v109_v28 = vrot.slane %v100_v25, %v108_v26  ;;  %v2811_v7 = vld [vmem:[%s3360_s1] sm:$0xff]  ;;  %s2640_s1 = smov 64  }
  0x3d   :  { %2199 = vmatpush3.msra.mxu1 %v2712_v9  ;;  %2237 = vmatpush3.msra.mxu0 %v2702_v2  ;;  %vm266_vm2 = vcmp.gt.s32.totalorder %v2811_v7, 0  ;;  %vm273_vm3 = vcmp.gt.s32.totalorder %v2811_v7, 7  ;;  %vm267_vm7 = vcmp.gt.s32.totalorder %v2811_v7, 1  ;;  %vm272_vm8 = vcmp.gt.s32.totalorder %v2811_v7, 6  ;;  %p2608_p10 = pnand %p2607_p9, %p2601_p6 }
  0x3e   :  { %2201 = vmatmul.mubr.f32.vlgmr.msra.gmra.mxu1 %v2636_v0  ;;  %2203 = vmatprep.subr.mxu1 %v2636_v0  ;;  %vm268_vm11 = vcmp.gt.s32.totalorder %v2811_v7, 2  ;;  %vm271_vm12 = vcmp.gt.s32.totalorder %v2811_v7, 5  ;;  %vm269_vm15 = vcmp.gt.s32.totalorder %v2811_v7, 3 }
  0x3f   :  { %2075 = vmatmul.mubr.msk.f32.gmra.mxu0 %vm112_vm1, %v89_v10  ;;  %2204 = vmatpush3.msra.mxu1 %v2718_v11 }
  0x40   :  { %213 = vmatprep.mubr.f32.mxu0 %v2636_v0  ;;  %2205 = vmatprep.subr.mxu1 %v2636_v0 }
  0x41   :  { %2206 = vmatpush3.msra.mxu1 %v2724_v12  ;;  %2211 = vmatprep.mubr.msk.f32.mxu1 %vm2637_vm0, %v2636_v0 }
  0x42   :  { %2207 = vmatprep.subr.mxu1 %v2636_v0  ;;  %2238 = vmatprep.subr.mxu0 %v2636_v0 }
  0x43   :  { %2076 = vmatmul.mubr.msk.f32.gmra.mxu0 %vm112_vm1, %v90_v13  ;;  %2208 = vmatpush3.msra.mxu1 %v2730_v14  ;;  %v470_v13 = vsel %vm266_vm2, 1, %v2638_v21 }
  0x44   :  { %219 = vmatprep.mubr.f32.mxu0 %v2636_v0  ;;  %2209 = vmatprep.subr.mxu1 %v2636_v0 }
  0x45   :  { %2210 = vmatpush3.msra.mxu1 %v2736_v15  ;;  %2239 = vmatpush3.msra.mxu0 %v2705_v5 }
  0x46   :  { %2212 = vmatmul.mubr.f32.vlgmr.msra.gmra.mxu1 %v2636_v0  ;;  %2214 = vmatprep.subr.mxu1 %v2636_v0 }
  0x47   :  { %2077 = vmatmul.mubr.msk.f32.gmra.mxu0 %vm112_vm1, %v91_v16  ;;  %2215 = vmatpush3.msra.mxu1 %v2702_v2 }
  0x48   :  { %225 = vmatprep.mubr.f32.mxu0 %v2636_v0  ;;  %2216 = vmatprep.subr.mxu1 %v2636_v0 }
  0x49   :  { %2217 = vmatpush3.msra.mxu1 %v2705_v5  ;;  %2222 = vmatprep.mubr.msk.f32.mxu1 %vm2637_vm0, %v2636_v0 }
  0x4a   :  { %2218 = vmatprep.subr.mxu1 %v2636_v0  ;;  %2240 = vmatprep.subr.mxu0 %v2636_v0 }
  0x4b   :  { %2078 = vmatmul.mubr.msk.f32.gmra.mxu0 %vm112_vm1, %v92_v17  ;;  %2219 = vmatpush3.msra.mxu1 %v2708_v8 }
  0x4c   :  { %231 = vmatprep.mubr.f32.mxu0 %v2636_v0  ;;  %2220 = vmatprep.subr.mxu1 %v2636_v0 }
  0x4d   :  { %2221 = vmatpush3.msra.mxu1 %v2712_v9  ;;  %2241 = vmatpush3.msra.mxu0 %v2708_v8 }
  0x4e   :  { %2225 = vmatprep.subr.mxu1 %v2636_v0  ;;  %2242 = vmatprep.subr.mxu0 %v2636_v0 }
  0x4f   :  { %2079 = vmatmul.mubr.msk.f32.gmra.mxu0 %vm112_vm1, %v93_v18  ;;  %2382 = vset.pattern.permute.xlu0 %v2638_v21 }
  0x50   :  { %237 = vmatprep.mubr.f32.mxu0 %v2636_v0  ;;  %2243 = vmatpush3.msra.mxu0 %v2712_v9 }
  0x51   :  { %2258 = vmatprep.subr.mxu0 %v2636_v0  ;;  %2383 = vset.pattern.permute.xlu1 %v2638_v21 }
  0x53   :  { %2080 = vmatmul.mubr.msk.f32.gmra.mxu0 %vm112_vm1, %v94_v19 }
  0x54   :  { %243 = vmatprep.mubr.f32.mxu0 %v2636_v0 }
  0x57   :  { %2081 = vmatmul.mubr.msk.f32.gmra.mxu0 %vm112_vm1, %v95_v20  ;;  %vm270_vm1 = vcmp.gt.s32.totalorder %v2811_v7, 4 }
  0x58   :  { %2244 = vmatprep.mubr.msk.f32.mxu0 %vm2637_vm0, %v2636_v0 }
  0xfa   :  { %v203_v29 = vpop.f32.mrf.mxu0 }
  0xfb   :  { %v204_v30 = vadd.f32 %v203_v29, %v105_v27 }
  0xfc   :  { %v205_v31 = vpop.f32.mrf.mxu0 }
  0xfd   :  { %v2779_v32 = vadd.f32 %v205_v31, %v109_v28 }
  0xfe   :  { %v346_v33 = vpop.f32.mrf.mxu1 }
  0xff   :  { %v350_v34 = vadd.f32 %v346_v33, %v204_v30  ;;  %v209_v35 = vpop.f32.mrf.mxu0 }
 0x100   :  { %v2781_v36 = vadd.f32 %v209_v35, %v105_v27  ;;  %v2202_v37 = vpop.f32.mrf.mxu1 }
 0x101   :  { %2384 = vtanh.f32 %v350_v34  ;;  %v211_v38 = vpop.f32.mrf.mxu0  ;;  %v2082_v16 = vmul.f32 -1.442695, %v350_v34  ;;  %v481_v34 = vsel %vm273_vm3, 1, %v2638_v21 }
 0x102   :  { %v2783_v39 = vadd.f32 %v211_v38, %v109_v28 }
 0x103   :  { %v215_v40 = vpop.f32.mrf.mxu0 }
 0x104   :  { %v2785_v41 = vadd.f32 %v215_v40, %v105_v27 }
 0x105   :  { %v217_v42 = vpop.f32.mrf.mxu0 }
 0x106   :  { %v2787_v43 = vadd.f32 %v217_v42, %v109_v28  ;;  %v441_v44 = vpop.f32.mrf.mxu1 }
 0x107   :  { %v221_v45 = vpop.f32.mrf.mxu0 }
 0x108   :  { %v2789_v46 = vadd.f32 %v221_v45, %v105_v27  ;;  %v2213_v47 = vpop.f32.mrf.mxu1 }
 0x109   :  { %v223_v48 = vpop.f32.mrf.mxu0 }
 0x10a   :  { %v2791_v49 = vadd.f32 %v223_v48, %v109_v28 }
 0x10b   :  { %v227_v50 = vpop.f32.mrf.mxu0 }
 0x10c   :  { %v2793_v51 = vadd.f32 %v227_v50, %v105_v27 }
 0x10d   :  { %v229_v52 = vpop.f32.mrf.mxu0 }
 0x10e   :  { %v2385_v53 = vpop.eup %2384  ;;  %v2795_v54 = vadd.f32 %v229_v52, %v109_v28 }
 0x10f   :  { %v233_v55 = vpop.f32.mrf.mxu0  ;;  %360 = vrot.lane.b32.xlu0 %v2385_v53, %s2639_s5 }
 0x110   :  { %v2798_v56 = vadd.f32 %v233_v55, %v105_v27 }
 0x111   :  { %v235_v57 = vpop.f32.mrf.mxu0 }
 0x112   :  { %v2800_v58 = vadd.f32 %v235_v57, %v109_v28 }
 0x113   :  { %v239_v59 = vpop.f32.mrf.mxu0 }
 0x114   :  { %v2802_v60 = vadd.f32 %v239_v59, %v105_v27 }
 0x115   :  { %v241_v61 = vpop.f32.mrf.mxu0 }
 0x116   :  { %v2804_v62 = vadd.f32 %v241_v61, %v109_v28 }
 0x117   :  { %v245_v63 = vpop.f32.mrf.mxu0 }
 0x118   :  { %v2806_v1 = vadd.f32 %v245_v63, %v105_v27 }
 0x119   :  { %v247_v3 = vpop.f32.mrf.mxu0 }
 0x11a   :  { %v248_v4 = vadd.f32 %v247_v3, %v109_v28 }
 0x11c   :  { %v445_v6 = vadd.f32 %v441_v44, %v248_v4 }
 0x11e   :  { %2386 = vtanh.f32 %v445_v6  ;;  %v2083_v19 = vmul.f32 -1.442695, %v445_v6 }
 0x11f   :  { %2388 = vpow2.f32 %v2082_v16 }
 0x12b   :  { %v2387_v10 = vpop.eup %2386 }
 0x12c   :  { %455 = vrot.lane.b32.xlu0 %v2387_v10, %s2639_s5  ;;  %v2389_v17 = vpop.eup %2388 }
 0x12d   :  { %v354_v18 = vadd.f32 1.0, %v2389_v17 }
 0x12f   :  { %2390 = vrcp.f32 %v354_v18 }
 0x130   :  { %472 = vperm.xlu0 %2382, %v470_v13   ;;  %2392 = vpow2.f32 %v2083_v19 }
 0x13c   :  { %v2391_v20 = vpop.eup %2390 }
 0x13d   :  { %v2393_v24 = vpop.eup %2392  ;;  %v358_v29 = vmul.f32 0.0, %v2391_v20 }
 0x13e   :  { %v449_v25 = vadd.f32 1.0, %v2393_v24 }
 0x140   :  { %2394 = vrcp.f32 %v449_v25 }
 0x14d   :  { %v2395_v26 = vpop.eup %2394 }
 0x14e   :  { %v453_v35 = vmul.f32 0.0, %v2395_v26 }
 0x181   :  { %v361_v22 = vpop.permute.xlu0 %360 }
 0x182   :  { %v363_v23 = vmul.f32 %v2391_v20, %v361_v22 }
 0x184   :  { %365 = vrot.lane.b32.xlu1 %v363_v23, %s2639_s5 }
 0x19e   :  { %v456_v27 = vpop.permute.xlu0 %455 }
 0x19f   :  { %v458_v28 = vmul.f32 %v2395_v26, %v456_v27 }
 0x1a1   :  { %460 = vrot.lane.b32.xlu1 %v458_v28, %s2639_s5  ;;  %v703_v28 = vsel %vm272_vm8, 1, %v2638_v21 }
 0x1ab   :  { %v2828_v42 = vpop.permute.xlu0 %472 }
 0x1ac   :  { %vm474_vm4 = vcmp.eq.s32.totalorder %v2828_v42, 1 }
 0x1f6   :  { %v366_v30 = vpop.permute.xlu1 %365 }
 0x1f7   :  { %v2818_v31 = vadd.f32 %v366_v30, %v358_v29 }
 0x1f9   :  { %2396 = vtanh.f32 %v2818_v31  ;;  %v2883_v29 = vsel %vm474_vm4, %v2818_v31, 0.0 }
 0x206   :  { %v2397_v33 = vpop.eup %2396 }
 0x207   :  { %371 = vrot.lane.b32.xlu1 %v2397_v33, %s2639_s5 }
 0x20b   :  { %483 = vperm.xlu1 %2383, %v481_v34  }
 0x213   :  { %v461_v37 = vpop.permute.xlu1 %460 }
 0x214   :  { %v2824_v38 = vadd.f32 %v461_v37, %v453_v35 }
 0x216   :  { %2398 = vtanh.f32 %v2824_v38 }
 0x223   :  { %v2399_v40 = vpop.eup %2398 }
 0x224   :  { %466 = vrot.lane.b32.xlu0 %v2399_v40, %s2639_s5 }
 0x279   :  { %v372_v44 = vpop.permute.xlu1 %371 }
 0x27a   :  { %v374_v45 = vmul.f32 %v2391_v20, %v372_v44 }
 0x27c   :  { %v2833_v47 = vsel %vm474_vm4, %v374_v45, 0.0 }
 0x27d   :  { %477 = vrot.lane.b32.xlu1 %v2833_v47, %s2640_s1 }
 0x286   :  { %v2837_v48 = vpop.permute.xlu1 %483 }
 0x287   :  { %vm485_vm5 = vcmp.eq.s32.totalorder %v2837_v48, 1 }
 0x288   :  { %v2893_v37 = vsel %vm485_vm5, %v2824_v38, 0.0 }
 0x296   :  { %v467_v50 = vpop.permute.xlu0 %466 }
 0x297   :  { %v469_v52 = vmul.f32 %v2395_v26, %v467_v50 }
 0x299   :  { %v2842_v53 = vsel %vm485_vm5, %v469_v52, 0.0 }
 0x29a   :  { %488 = vrot.lane.b32.xlu0 %v2842_v53, %s2640_s1 }
 0x2ef   :  { %v478_v55 = vpop.permute.xlu1 %477 }
 0x2f0   :  { %480 = vst.msk [vmem:[#allocation11] sm:$0xff] %vm276_vm6, %v478_v55  ;;  %2223 = vmatmul.mubr.msk.f32.vlgmr.msra.gmra.mxu1 %vm276_vm6, %v478_v55 }
 0x2f1   :  { %2226 = vmatpush3.msra.mxu1 %v2718_v11  ;;  %2233 = vmatprep.mubr.msk.f32.mxu1 %vm2637_vm0, %v2636_v0 }
 0x2f2   :  { %2227 = vmatprep.subr.mxu1 %v2636_v0 }
 0x2f3   :  { %2228 = vmatpush3.msra.mxu1 %v2724_v12 }
 0x2f4   :  { %2229 = vmatprep.subr.mxu1 %v2636_v0 }
 0x2f5   :  { %2230 = vmatpush3.msra.mxu1 %v2730_v14 }
 0x2f6   :  { %2231 = vmatprep.subr.mxu1 %v2636_v0 }
 0x2f7   :  { %2232 = vmatpush3.msra.mxu1 %v2736_v15 }
 0x2f8   :  { %2247 = vmatprep.subr.mxu1 %v2636_v0 }
 0x30c   :  { %v489_v57 = vpop.permute.xlu0 %488 }
 0x30d   :  { %492 = vst.msk [vmem:[#allocation11 + $0x78] sm:$0xff] %vm276_vm6, %v489_v57  ;;  %2234 = vmatmul.mubr.msk.f32.vlgmr.msra.gmra.mxu1 %vm276_vm6, %v489_v57 }
 0x30e   :  { %2248 = vmatpush3.msra.mxu1 %v2718_v11  ;;  %2255 = vmatprep.mubr.msk.f32.mxu1 %vm2637_vm0, %v2636_v0 }
 0x30f   :  { %2249 = vmatprep.subr.mxu1 %v2636_v0 }
 0x310   :  { %2250 = vmatpush3.msra.mxu1 %v2724_v12 }
 0x311   :  { %2251 = vmatprep.subr.mxu1 %v2636_v0 }
 0x312   :  { %2252 = vmatpush3.msra.mxu1 %v2730_v14 }
 0x313   :  { %2253 = vmatprep.subr.mxu1 %v2636_v0 }
 0x314   :  { %2254 = vmatpush3.msra.mxu1 %v2736_v15 }
 0x315   :  { %2269 = vmatprep.subr.mxu1 %v2636_v0 }
 0x3b0   :  { %v565_v59 = vpop.f32.mrf.mxu1 }
 0x3b1   :  { %v569_v61 = vadd.f32 %v565_v59, %v2781_v36 }
 0x3b2   :  { %v2224_v63 = vpop.f32.mrf.mxu1 }
 0x3b3   :  { %2400 = vtanh.f32 %v569_v61  ;;  %v2085_v16 = vmul.f32 -1.442695, %v569_v61 }
 0x3c0   :  { %v2401_v3 = vpop.eup %2400 }
 0x3c1   :  { %579 = vrot.lane.b32.xlu1 %v2401_v3, %s2639_s5 }
 0x3cd   :  { %v662_v4 = vpop.f32.mrf.mxu1 }
 0x3ce   :  { %v666_v6 = vadd.f32 %v662_v4, %v2804_v62  ;;  %v691_v62 = vsel %vm267_vm7, 1, %v2638_v21 }
 0x3cf   :  { %v2235_v10 = vpop.f32.mrf.mxu1 }
 0x3d0   :  { %2402 = vtanh.f32 %v666_v6  ;;  %v2087_v19 = vmul.f32 -1.442695, %v666_v6 }
 0x3d1   :  { %2404 = vpow2.f32 %v2085_v16 }
 0x3dd   :  { %v2403_v13 = vpop.eup %2402 }
 0x3de   :  { %676 = vrot.lane.b32.xlu0 %v2403_v13, %s2639_s5  ;;  %v2405_v17 = vpop.eup %2404 }
 0x3df   :  { %v573_v18 = vadd.f32 1.0, %v2405_v17 }
 0x3e1   :  { %2406 = vrcp.f32 %v573_v18 }
 0x3e2   :  { %2408 = vpow2.f32 %v2087_v19 }
 0x3ee   :  { %v2407_v36 = vpop.eup %2406 }
 0x3ef   :  { %v2409_v23 = vpop.eup %2408  ;;  %v577_v30 = vmul.f32 %v2407_v36, %v2883_v29 }
 0x3f0   :  { %v670_v24 = vadd.f32 1.0, %v2409_v23 }
 0x3f2   :  { %2410 = vrcp.f32 %v670_v24 }
 0x3ff   :  { %v2411_v25 = vpop.eup %2410 }
 0x400   :  { %v674_v40 = vmul.f32 %v2411_v25, %v2893_v37 }
 0x433   :  { %v580_v20 = vpop.permute.xlu1 %579 }
 0x434   :  { %v582_v22 = vmul.f32 %v2407_v36, %v580_v20 }
 0x436   :  { %584 = vrot.lane.b32.xlu1 %v582_v22, %s2639_s5 }
 0x43a   :  { %693 = vperm.xlu1 %2383, %v691_v62  }
 0x450   :  { %v677_v26 = vpop.permute.xlu0 %676 }
 0x451   :  { %v679_v27 = vmul.f32 %v2411_v25, %v677_v26 }
 0x453   :  { %681 = vrot.lane.b32.xlu0 %v679_v27, %s2639_s5 }
 0x457   :  { %705 = vperm.xlu0 %2382, %v703_v28  }
 0x4a8   :  { %v585_v33 = vpop.permute.xlu1 %584 }
 0x4a9   :  { %v2886_v34 = vadd.f32 %v585_v33, %v577_v30  ;;  %v933_v30 = vsel %vm271_vm12, 1, %v2638_v21 }
 0x4ab   :  { %2412 = vtanh.f32 %v2886_v34 }
 0x4b5   :  { %v2900_v50 = vpop.permute.xlu1 %693 }
 0x4b6   :  { %vm695_vm9 = vcmp.eq.s32.totalorder %v2900_v50, 1 }
 0x4b7   :  { %v2962_v33 = vsel %vm695_vm9, %v2886_v34, %v2883_v29 }
 0x4b8   :  { %v2413_v35 = vpop.eup %2412 }
 0x4b9   :  { %590 = vrot.lane.b32.xlu1 %v2413_v35, %s2639_s5 }
 0x4c5   :  { %v682_v44 = vpop.permute.xlu0 %681 }
 0x4c6   :  { %v2896_v31 = vadd.f32 %v682_v44, %v674_v40 }
 0x4c8   :  { %2414 = vtanh.f32 %v2896_v31 }
 0x4d2   :  { %v2913_v57 = vpop.permute.xlu0 %705 }
 0x4d3   :  { %vm707_vm10 = vcmp.eq.s32.totalorder %v2913_v57, 1 }
 0x4d5   :  { %v2415_v45 = vpop.eup %2414 }
 0x4d6   :  { %687 = vrot.lane.b32.xlu0 %v2415_v45, %s2639_s5 }
 0x52b   :  { %v591_v52 = vpop.permute.xlu1 %590 }
 0x52c   :  { %v2902_v55 = vmul.f32 %v2407_v36, %v591_v52  ;;  %v2973_v52 = vsel %vm707_vm10, %v2896_v31, %v2893_v37 }
 0x52e   :  { %v2909_v38 = vsel %vm695_vm9, %v2902_v55, %v2833_v47 }
 0x52f   :  { %722 = vrot.lane.b32.xlu1 %v2909_v38, %s2640_s1 }
 0x548   :  { %v688_v59 = vpop.permute.xlu0 %687 }
 0x549   :  { %v2915_v61 = vmul.f32 %v2411_v25, %v688_v59 }
 0x54b   :  { %v2922_v63 = vsel %vm707_vm10, %v2915_v61, %v2842_v53 }
 0x54c   :  { %822 = vrot.lane.b32.xlu0 %v2922_v63, %s2640_s1 }
 0x5a1   :  { %v723_v47 = vpop.permute.xlu1 %722 }
 0x5a2   :  { %2245 = vmatmul.mubr.msk.f32.vlgmr.msra.gmra.mxu0 %vm276_vm6, %v723_v47 }
 0x5a3   :  { %2259 = vmatpush3.msra.mxu0 %v2702_v2  ;;  %2266 = vmatprep.mubr.msk.f32.mxu0 %vm2637_vm0, %v2636_v0 }
 0x5a4   :  { %2260 = vmatprep.subr.mxu0 %v2636_v0 }
 0x5a5   :  { %2261 = vmatpush3.msra.mxu0 %v2705_v5 }
 0x5a6   :  { %2262 = vmatprep.subr.mxu0 %v2636_v0 }
 0x5a7   :  { %2263 = vmatpush3.msra.mxu0 %v2708_v8 }
 0x5a8   :  { %2264 = vmatprep.subr.mxu0 %v2636_v0 }
 0x5a9   :  { %2265 = vmatpush3.msra.mxu0 %v2712_v9 }
 0x5aa   :  { %2280 = vmatprep.subr.mxu0 %v2636_v0 }
 0x5be   :  { %v823_v53 = vpop.permute.xlu0 %822 }
 0x5bf   :  { %2256 = vmatmul.mubr.msk.f32.vlgmr.msra.gmra.mxu1 %vm276_vm6, %v823_v53 }
 0x5c0   :  { %2270 = vmatpush3.msra.mxu1 %v2718_v11  ;;  %2277 = vmatprep.mubr.msk.f32.mxu1 %vm2637_vm0, %v2636_v0 }
 0x5c1   :  { %2271 = vmatprep.subr.mxu1 %v2636_v0 }
 0x5c2   :  { %2272 = vmatpush3.msra.mxu1 %v2724_v12 }
 0x5c3   :  { %2273 = vmatprep.subr.mxu1 %v2636_v0 }
 0x5c4   :  { %2274 = vmatpush3.msra.mxu1 %v2730_v14 }
 0x5c5   :  { %2275 = vmatprep.subr.mxu1 %v2636_v0 }
 0x5c6   :  { %2276 = vmatpush3.msra.mxu1 %v2736_v15 }
 0x5c7   :  { %2291 = vmatprep.subr.mxu1 %v2636_v0 }
 0x662   :  { %v792_v3 = vpop.f32.mrf.mxu0 }
 0x663   :  { %v796_v4 = vadd.f32 %v792_v3, %v2785_v41 }
 0x664   :  { %v2246_v6 = vpop.f32.mrf.mxu0 }
 0x665   :  { %2416 = vtanh.f32 %v796_v4  ;;  %v2089_v19 = vmul.f32 -1.442695, %v796_v4 }
 0x672   :  { %v2417_v10 = vpop.eup %2416 }
 0x673   :  { %806 = vrot.lane.b32.xlu1 %v2417_v10, %s2639_s5 }
 0x67f   :  { %v892_v13 = vpop.f32.mrf.mxu1 }
 0x680   :  { %v896_v16 = vadd.f32 %v892_v13, %v2800_v58  ;;  %v921_v58 = vsel %vm268_vm11, 1, %v2638_v21 }
 0x681   :  { %v2257_v17 = vpop.f32.mrf.mxu1 }
 0x682   :  { %2418 = vtanh.f32 %v896_v16  ;;  %v2091_v22 = vmul.f32 -1.442695, %v896_v16 }
 0x683   :  { %2420 = vpow2.f32 %v2089_v19 }
 0x68f   :  { %v2419_v18 = vpop.eup %2418 }
 0x690   :  { %906 = vrot.lane.b32.xlu0 %v2419_v18, %s2639_s5  ;;  %v2421_v36 = vpop.eup %2420 }
 0x691   :  { %v800_v20 = vadd.f32 1.0, %v2421_v36 }
 0x693   :  { %2422 = vrcp.f32 %v800_v20 }
 0x694   :  { %2424 = vpow2.f32 %v2091_v22 }
 0x6a0   :  { %v2423_v41 = vpop.eup %2422 }
 0x6a1   :  { %v2425_v24 = vpop.eup %2424  ;;  %v804_v35 = vmul.f32 %v2423_v41, %v2962_v33 }
 0x6a2   :  { %v900_v25 = vadd.f32 1.0, %v2425_v24 }
 0x6a4   :  { %2426 = vrcp.f32 %v900_v25 }
 0x6b1   :  { %v2427_v26 = vpop.eup %2426 }
 0x6b2   :  { %v904_v59 = vmul.f32 %v2427_v26, %v2973_v52 }
 0x6e5   :  { %v807_v62 = vpop.permute.xlu1 %806 }
 0x6e6   :  { %v809_v23 = vmul.f32 %v2423_v41, %v807_v62 }
 0x6e8   :  { %811 = vrot.lane.b32.xlu1 %v809_v23, %s2639_s5 }
 0x6ec   :  { %923 = vperm.xlu1 %2383, %v921_v58  }
 0x702   :  { %v907_v27 = vpop.permute.xlu0 %906 }
 0x703   :  { %v909_v28 = vmul.f32 %v2427_v26, %v907_v27 }
 0x705   :  { %911 = vrot.lane.b32.xlu0 %v909_v28, %s2639_s5 }
 0x709   :  { %935 = vperm.xlu0 %2382, %v933_v30  }
 0x75a   :  { %v812_v40 = vpop.permute.xlu1 %811 }
 0x75b   :  { %v2965_v44 = vadd.f32 %v812_v40, %v804_v35 }
 0x75d   :  { %2428 = vtanh.f32 %v2965_v44 }
 0x767   :  { %v2980_v53 = vpop.permute.xlu1 %923 }
 0x768   :  { %vm925_vm13 = vcmp.eq.s32.totalorder %v2980_v53, 1 }
 0x76a   :  { %v2429_v45 = vpop.eup %2428 }
 0x76b   :  { %817 = vrot.lane.b32.xlu1 %v2429_v45, %s2639_s5  ;;  %v1163_v45 = vsel %vm270_vm1, 1, %v2638_v21 }
 0x777   :  { %v912_v29 = vpop.permute.xlu0 %911 }
 0x778   :  { %v2976_v34 = vadd.f32 %v912_v29, %v904_v59  ;;  %v3042_v59 = vsel %vm925_vm13, %v2965_v44, %v2962_v33 }
 0x77a   :  { %2430 = vtanh.f32 %v2976_v34 }
 0x784   :  { %v2993_v31 = vpop.permute.xlu0 %935 }
 0x785   :  { %vm937_vm14 = vcmp.eq.s32.totalorder %v2993_v31, 1 }
 0x787   :  { %v2431_v47 = vpop.eup %2430 }
 0x788   :  { %917 = vrot.lane.b32.xlu0 %v2431_v47, %s2639_s5 }
 0x7dd   :  { %v818_v3 = vpop.permute.xlu1 %817 }
 0x7de   :  { %v2982_v4 = vmul.f32 %v2423_v41, %v818_v3 }
 0x7e0   :  { %v2989_v37 = vsel %vm925_vm13, %v2982_v4, %v2909_v38 }
 0x7e1   :  { %952 = vrot.lane.b32.xlu1 %v2989_v37, %s2640_s1 }
 0x7fa   :  { %v918_v6 = vpop.permute.xlu0 %917 }
 0x7fb   :  { %v2995_v10 = vmul.f32 %v2427_v26, %v918_v6 }
 0x7fd   :  { %v3002_v13 = vsel %vm937_vm14, %v2995_v10, %v2922_v63 }
 0x7fe   :  { %1052 = vrot.lane.b32.xlu0 %v3002_v13, %s2640_s1 }
 0x853   :  { %v953_v38 = vpop.permute.xlu1 %952 }
 0x854   :  { %2267 = vmatmul.mubr.msk.f32.vlgmr.msra.gmra.mxu0 %vm276_vm6, %v953_v38 }
 0x855   :  { %2281 = vmatpush3.msra.mxu0 %v2702_v2  ;;  %2288 = vmatprep.mubr.msk.f32.mxu0 %vm2637_vm0, %v2636_v0 }
 0x856   :  { %2282 = vmatprep.subr.mxu0 %v2636_v0 }
 0x857   :  { %2283 = vmatpush3.msra.mxu0 %v2705_v5 }
 0x858   :  { %2284 = vmatprep.subr.mxu0 %v2636_v0 }
 0x859   :  { %2285 = vmatpush3.msra.mxu0 %v2708_v8 }
 0x85a   :  { %2286 = vmatprep.subr.mxu0 %v2636_v0 }
 0x85b   :  { %2287 = vmatpush3.msra.mxu0 %v2712_v9 }
 0x85c   :  { %2302 = vmatprep.subr.mxu0 %v2636_v0 }
 0x870   :  { %v1053_v63 = vpop.permute.xlu0 %1052 }
 0x871   :  { %2278 = vmatmul.mubr.msk.f32.vlgmr.msra.gmra.mxu1 %vm276_vm6, %v1053_v63 }
 0x872   :  { %2292 = vmatpush3.msra.mxu1 %v2718_v11  ;;  %2299 = vmatprep.mubr.msk.f32.mxu1 %vm2637_vm0, %v2636_v0 }
 0x873   :  { %2293 = vmatprep.subr.mxu1 %v2636_v0 }
 0x874   :  { %2294 = vmatpush3.msra.mxu1 %v2724_v12 }
 0x875   :  { %2295 = vmatprep.subr.mxu1 %v2636_v0 }
 0x876   :  { %2296 = vmatpush3.msra.mxu1 %v2730_v14 }
 0x877   :  { %2297 = vmatprep.subr.mxu1 %v2636_v0 }
 0x878   :  { %2298 = vmatpush3.msra.mxu1 %v2736_v15 }
 0x879   :  { %2313 = vmatprep.subr.mxu1 %v2636_v0 }
 0x914   :  { %v1022_v16 = vpop.f32.mrf.mxu0 }
 0x915   :  { %v1026_v17 = vadd.f32 %v1022_v16, %v2789_v46 }
 0x916   :  { %v2268_v18 = vpop.f32.mrf.mxu0 }
 0x917   :  { %2432 = vtanh.f32 %v1026_v17  ;;  %v2093_v62 = vmul.f32 -1.442695, %v1026_v17 }
 0x924   :  { %v2433_v19 = vpop.eup %2432 }
 0x925   :  { %1036 = vrot.lane.b32.xlu1 %v2433_v19, %s2639_s5 }
 0x931   :  { %v1122_v36 = vpop.f32.mrf.mxu1 }
 0x932   :  { %v1126_v20 = vadd.f32 %v1122_v36, %v2795_v54  ;;  %v1151_v54 = vsel %vm269_vm15, 1, %v2638_v21  ;;  %v3053_v21 = vsel %vm937_vm14, %v2976_v34, %v2973_v52 }
 0x933   :  { %v2279_v22 = vpop.f32.mrf.mxu1 }
 0x934   :  { %2434 = vtanh.f32 %v1126_v20  ;;  %v2095_v24 = vmul.f32 -1.442695, %v1126_v20 }
 0x935   :  { %2436 = vpow2.f32 %v2093_v62 }
 0x941   :  { %v2435_v41 = vpop.eup %2434 }
 0x942   :  { %1136 = vrot.lane.b32.xlu0 %v2435_v41, %s2639_s5  ;;  %v2437_v23 = vpop.eup %2436 }
 0x943   :  { %v1030_v58 = vadd.f32 1.0, %v2437_v23 }
 0x945   :  { %2438 = vrcp.f32 %v1030_v58 }
 0x946   :  { %2440 = vpow2.f32 %v2095_v24 }
 0x952   :  { %v2439_v46 = vpop.eup %2438 }
 0x953   :  { %v2441_v27 = vpop.eup %2440  ;;  %v1034_v29 = vmul.f32 %v2439_v46, %v3042_v59 }
 0x954   :  { %v1130_v28 = vadd.f32 1.0, %v2441_v27 }
 0x956   :  { %2442 = vrcp.f32 %v1130_v28 }
 0x963   :  { %v2443_v30 = vpop.eup %2442 }
 0x964   :  { %v1134_v7 = vmul.f32 %v2443_v30, %v3053_v21 }
 0x997   :  { %v1037_v25 = vpop.permute.xlu1 %1036 }
 0x998   :  { %v1039_v26 = vmul.f32 %v2439_v46, %v1037_v25 }
 0x99a   :  { %1041 = vrot.lane.b32.xlu1 %v1039_v26, %s2639_s5 }
 0x99e   :  { %1153 = vperm.xlu1 %2383, %v1151_v54  }
 0x9b4   :  { %v1137_v35 = vpop.permute.xlu0 %1136 }
 0x9b5   :  { %v1139_v40 = vmul.f32 %v2443_v30, %v1137_v35 }
 0x9b7   :  { %1141 = vrot.lane.b32.xlu0 %v1139_v40, %s2639_s5 }
 0x9bb   :  { %1165 = vperm.xlu0 %2382, %v1163_v45  }
 0xa0c   :  { %v1042_v47 = vpop.permute.xlu1 %1041 }
 0xa0d   :  { %v3045_v3 = vadd.f32 %v1042_v47, %v1034_v29 }
 0xa0f   :  { %2444 = vtanh.f32 %v3045_v3 }
 0xa19   :  { %v3060_v63 = vpop.permute.xlu1 %1153 }
 0xa1a   :  { %vm1155_vm2 = vcmp.eq.s32.totalorder %v3060_v63, 1 }
 0xa1b   :  { %v3118_v29 = vsel %vm1155_vm2, %v3045_v3, %v3042_v59 }
 0xa1c   :  { %v2445_v6 = vpop.eup %2444 }
 0xa1d   :  { %1047 = vrot.lane.b32.xlu1 %v2445_v6, %s2639_s5 }
 0xa29   :  { %v1142_v33 = vpop.permute.xlu0 %1141 }
 0xa2a   :  { %v3056_v44 = vadd.f32 %v1142_v33, %v1134_v7 }
 0xa2c   :  { %2446 = vtanh.f32 %v3056_v44 }
 0xa36   :  { %v3073_v34 = vpop.permute.xlu0 %1165 }
 0xa37   :  { %vm1167_vm3 = vcmp.eq.s32.totalorder %v3073_v34, 1 }
 0xa39   :  { %v2447_v38 = vpop.eup %2446 }
 0xa3a   :  { %1147 = vrot.lane.b32.xlu0 %v2447_v38, %s2639_s5  ;;  %v3129_v38 = vsel %vm1167_vm3, %v3056_v44, %v3053_v21 }
 0xa8f   :  { %v1048_v16 = vpop.permute.xlu1 %1047 }
 0xa90   :  { %v3062_v17 = vmul.f32 %v2439_v46, %v1048_v16 }
 0xa92   :  { %v3069_v52 = vsel %vm1155_vm2, %v3062_v17, %v2989_v37 }
 0xa93   :  { %1182 = vrot.lane.b32.xlu1 %v3069_v52, %s2640_s1 }
 0xaac   :  { %v1148_v18 = vpop.permute.xlu0 %1147 }
 0xaad   :  { %v3075_v19 = vmul.f32 %v2443_v30, %v1148_v18 }
 0xaaf   :  { %v3082_v36 = vsel %vm1167_vm3, %v3075_v19, %v3002_v13 }
 0xab0   :  { %1282 = vrot.lane.b32.xlu0 %v3082_v36, %s2640_s1 }
 0xb05   :  { %v1183_v37 = vpop.permute.xlu1 %1182 }
 0xb06   :  { %2289 = vmatmul.mubr.msk.f32.vlgmr.msra.gmra.mxu0 %vm276_vm6, %v1183_v37 }
 0xb07   :  { %2303 = vmatpush3.msra.mxu0 %v2702_v2  ;;  %2310 = vmatprep.mubr.msk.f32.mxu0 %vm2637_vm0, %v2636_v0 }
 0xb08   :  { %2304 = vmatprep.subr.mxu0 %v2636_v0 }
 0xb09   :  { %2305 = vmatpush3.msra.mxu0 %v2705_v5 }
 0xb0a   :  { %2306 = vmatprep.subr.mxu0 %v2636_v0 }
 0xb0b   :  { %2307 = vmatpush3.msra.mxu0 %v2708_v8 }
 0xb0c   :  { %2308 = vmatprep.subr.mxu0 %v2636_v0 }
 0xb0d   :  { %2309 = vmatpush3.msra.mxu0 %v2712_v9 }
 0xb0e   :  { %2324 = vmatprep.subr.mxu0 %v2636_v0 }
 0xb22   :  { %v1283_v13 = vpop.permute.xlu0 %1282 }
 0xb23   :  { %2300 = vmatmul.mubr.msk.f32.vlgmr.msra.gmra.mxu1 %vm276_vm6, %v1283_v13 }
 0xb24   :  { %2314 = vmatpush3.msra.mxu1 %v2718_v11  ;;  %2321 = vmatprep.mubr.msk.f32.mxu1 %vm2637_vm0, %v2636_v0 }
 0xb25   :  { %2315 = vmatprep.subr.mxu1 %v2636_v0 }
 0xb26   :  { %2316 = vmatpush3.msra.mxu1 %v2724_v12 }
 0xb27   :  { %2317 = vmatprep.subr.mxu1 %v2636_v0 }
 0xb28   :  { %2318 = vmatpush3.msra.mxu1 %v2730_v14 }
 0xb29   :  { %2319 = vmatprep.subr.mxu1 %v2636_v0 }
 0xb2a   :  { %2320 = vmatpush3.msra.mxu1 %v2736_v15 }
 0xb2b   :  { %2335 = vmatprep.subr.mxu1 %v2636_v0 }
 0xbc6   :  { %v1252_v2 = vpop.f32.mrf.mxu0 }
 0xbc7   :  { %v1256_v20 = vadd.f32 %v1252_v2, %v2793_v51 }
 0xbc8   :  { %v2290_v22 = vpop.f32.mrf.mxu0 }
 0xbc9   :  { %2448 = vtanh.f32 %v1256_v20  ;;  %v2097_v46 = vmul.f32 -1.442695, %v1256_v20 }
 0xbd6   :  { %v2449_v41 = vpop.eup %2448 }
 0xbd7   :  { %1266 = vrot.lane.b32.xlu1 %v2449_v41, %s2639_s5 }
 0xbe3   :  { %v1352_v62 = vpop.f32.mrf.mxu1 }
 0xbe4   :  { %v1356_v23 = vadd.f32 %v1352_v62, %v2791_v49 }
 0xbe5   :  { %v2301_v58 = vpop.f32.mrf.mxu1 }
 0xbe6   :  { %2450 = vtanh.f32 %v1356_v23  ;;  %v2099_v54 = vmul.f32 -1.442695, %v1356_v23 }
 0xbe7   :  { %2452 = vpow2.f32 %v2097_v46 }
 0xbf3   :  { %v2451_v24 = vpop.eup %2450 }
 0xbf4   :  { %1366 = vrot.lane.b32.xlu0 %v2451_v24, %s2639_s5  ;;  %v2453_v25 = vpop.eup %2452 }
 0xbf5   :  { %v1260_v26 = vadd.f32 1.0, %v2453_v25 }
 0xbf7   :  { %2454 = vrcp.f32 %v1260_v26 }
 0xbf8   :  { %2456 = vpow2.f32 %v2099_v54 }
 0xc04   :  { %v2455_v51 = vpop.eup %2454 }
 0xc05   :  { %v2457_v30 = vpop.eup %2456  ;;  %v1264_v47 = vmul.f32 %v2455_v51, %v3118_v29 }
 0xc06   :  { %v1360_v35 = vadd.f32 1.0, %v2457_v30 }
 0xc08   :  { %2458 = vrcp.f32 %v1360_v35 }
 0xc15   :  { %v2459_v49 = vpop.eup %2458 }
 0xc16   :  { %v1364_v16 = vmul.f32 %v2459_v49, %v3129_v38 }
 0xc49   :  { %v1267_v27 = vpop.permute.xlu1 %1266 }
 0xc4a   :  { %v1269_v28 = vmul.f32 %v2455_v51, %v1267_v27 }
 0xc4c   :  { %1271 = vrot.lane.b32.xlu1 %v1269_v28, %s2639_s5 }
 0xc66   :  { %v1367_v40 = vpop.permute.xlu0 %1366 }
 0xc67   :  { %v1369_v45 = vmul.f32 %v2459_v49, %v1367_v40 }
 0xc69   :  { %1371 = vrot.lane.b32.xlu0 %v1369_v45, %s2639_s5 }
 0xcbe   :  { %v1272_v6 = vpop.permute.xlu1 %1271 }
 0xcbf   :  { %v3121_v7 = vadd.f32 %v1272_v6, %v1264_v47 }
 0xcc1   :  { %2460 = vtanh.f32 %v3121_v7  ;;  %v3190_v28 = vsel %vm1167_vm3, %v3121_v7, %v3118_v29 }
 0xcce   :  { %v2461_v33 = vpop.eup %2460 }
 0xccf   :  { %1277 = vrot.lane.b32.xlu1 %v2461_v33, %s2639_s5 }
 0xcdb   :  { %v1372_v59 = vpop.permute.xlu0 %1371 }
 0xcdc   :  { %v3132_v3 = vadd.f32 %v1372_v59, %v1364_v16 }
 0xcde   :  { %2462 = vtanh.f32 %v3132_v3  ;;  %v3201_v45 = vsel %vm1155_vm2, %v3132_v3, %v3129_v38 }
 0xceb   :  { %v2463_v18 = vpop.eup %2462 }
 0xcec   :  { %1377 = vrot.lane.b32.xlu0 %v2463_v18, %s2639_s5 }
 0xd41   :  { %v1278_v37 = vpop.permute.xlu1 %1277 }
 0xd42   :  { %v3136_v13 = vmul.f32 %v2455_v51, %v1278_v37 }
 0xd44   :  { %v3142_v2 = vsel %vm1167_vm3, %v3136_v13, %v3069_v52  ;;  %v3157_v52 = vld [vmem:[#allocation8 + $0x18] sm:$0xff] }
 0xd45   :  { %1402 = vrot.lane.b32.xlu1 %v3142_v2, %s2640_s1 }
 0xd5e   :  { %v1378_v21 = vpop.permute.xlu0 %1377 }
 0xd5f   :  { %v3146_v44 = vmul.f32 %v2459_v49, %v1378_v21  ;;  %v2514_v21 = vld [vmem:[#allocation8 + $0x8] sm:$0xff] }
 0xd61   :  { %v3152_v20 = vsel %vm1155_vm2, %v3146_v44, %v3082_v36 }
 0xd62   :  { %1502 = vrot.lane.b32.xlu0 %v3152_v20, %s2640_s1 }
 0xdb7   :  { %v1403_v22 = vpop.permute.xlu1 %1402 }
 0xdb8   :  { %2311 = vmatmul.mubr.msk.f32.vlgmr.msra.gmra.mxu0 %vm276_vm6, %v1403_v22 }
 0xdb9   :  { %2325 = vmatpush3.msra.mxu0 %v3157_v52  ;;  %2332 = vmatprep.mubr.msk.f32.mxu0 %vm2637_vm0, %v2636_v0 }
 0xdba   :  { %2326 = vmatprep.subr.mxu0 %v2636_v0 }
 0xdbb   :  { %2327 = vmatpush3.msra.mxu0 %v2705_v5 }
 0xdbc   :  { %2328 = vmatprep.subr.mxu0 %v2636_v0 }
 0xdbd   :  { %2329 = vmatpush3.msra.mxu0 %v2708_v8 }
 0xdbe   :  { %2330 = vmatprep.subr.mxu0 %v2636_v0 }
 0xdbf   :  { %2331 = vmatpush3.msra.mxu0 %v2712_v9 }
 0xdc0   :  { %2346 = vmatprep.subr.mxu0 %v2636_v0 }
 0xdd4   :  { %v1503_v36 = vpop.permute.xlu0 %1502 }
 0xdd5   :  { %2322 = vmatmul.mubr.msk.f32.vlgmr.msra.gmra.mxu1 %vm276_vm6, %v1503_v36  ;;  %v2516_v36 = vld [vmem:[#allocation9 + $0x18] sm:$0xff] }
 0xdd6   :  { %2336 = vmatpush3.msra.mxu1 %v2718_v11  ;;  %2343 = vmatprep.mubr.msk.f32.mxu1 %vm2637_vm0, %v2636_v0 }
 0xdd7   :  { %2337 = vmatprep.subr.mxu1 %v2636_v0 }
 0xdd8   :  { %2338 = vmatpush3.msra.mxu1 %v2724_v12 }
 0xdd9   :  { %2339 = vmatprep.subr.mxu1 %v2636_v0 }
 0xdda   :  { %2340 = vmatpush3.msra.mxu1 %v2730_v14 }
 0xddb   :  { %2341 = vmatprep.subr.mxu1 %v2636_v0 }
 0xddc   :  { %2342 = vmatpush3.msra.mxu1 %v2736_v15 }
 0xddd   :  { %2357 = vmatprep.subr.mxu1 %v2636_v0 }
 0xe78   :  { %v1472_v5 = vpop.f32.mrf.mxu0 }
 0xe79   :  { %v1476_v8 = vadd.f32 %v1472_v5, %v2798_v56  ;;  %v2518_v5 = vld [vmem:[#allocation9 + $0x8] sm:$0xff] }
 0xe7a   :  { %v2312_v9 = vpop.f32.mrf.mxu0 }
 0xe7b   :  { %2464 = vtanh.f32 %v1476_v8  ;;  %v2101_v23 = vmul.f32 -1.442695, %v1476_v8  ;;  %v2519_v8 = vld [vmem:[#allocation9] sm:$0xff] }
 0xe88   :  { %v2465_v11 = vpop.eup %2464 }
 0xe89   :  { %1486 = vrot.lane.b32.xlu1 %v2465_v11, %s2639_s5 }
 0xe95   :  { %v1572_v41 = vpop.f32.mrf.mxu1 }
 0xe96   :  { %v1576_v12 = vadd.f32 %v1572_v41, %v2787_v43 }
 0xe97   :  { %v2323_v62 = vpop.f32.mrf.mxu1 }
 0xe98   :  { %2466 = vtanh.f32 %v1576_v12  ;;  %v2103_v24 = vmul.f32 -1.442695, %v1576_v12 }
 0xe99   :  { %2468 = vpow2.f32 %v2101_v23 }
 0xea5   :  { %v2467_v14 = vpop.eup %2466 }
 0xea6   :  { %1586 = vrot.lane.b32.xlu0 %v2467_v14, %s2639_s5  ;;  %v2469_v15 = vpop.eup %2468 }
 0xea7   :  { %v1480_v58 = vadd.f32 1.0, %v2469_v15 }
 0xea9   :  { %2470 = vrcp.f32 %v1480_v58 }
 0xeaa   :  { %2472 = vpow2.f32 %v2103_v24 }
 0xeb6   :  { %v2471_v56 = vpop.eup %2470 }
 0xeb7   :  { %v2473_v26 = vpop.eup %2472  ;;  %v1484_v30 = vmul.f32 %v2471_v56, %v3190_v28 }
 0xeb8   :  { %v1580_v54 = vadd.f32 1.0, %v2473_v26 }
 0xeba   :  { %2474 = vrcp.f32 %v1580_v54 }
 0xec7   :  { %v2475_v43 = vpop.eup %2474 }
 0xec8   :  { %v1584_v47 = vmul.f32 %v2475_v43, %v3201_v45 }
 0xefb   :  { %v1487_v46 = vpop.permute.xlu1 %1486 }
 0xefc   :  { %v1489_v25 = vmul.f32 %v2471_v56, %v1487_v46 }
 0xefe   :  { %1491 = vrot.lane.b32.xlu1 %v1489_v25, %s2639_s5 }
 0xf18   :  { %v1587_v51 = vpop.permute.xlu0 %1586 }
 0xf19   :  { %v1589_v27 = vmul.f32 %v2475_v43, %v1587_v51 }
 0xf1b   :  { %1591 = vrot.lane.b32.xlu0 %v1589_v27, %s2639_s5 }
 0xf70   :  { %v1492_v35 = vpop.permute.xlu1 %1491 }
 0xf71   :  { %v3193_v49 = vadd.f32 %v1492_v35, %v1484_v30 }
 0xf73   :  { %2476 = vtanh.f32 %v3193_v49  ;;  %v1616_v27 = vsel %vm937_vm14, %v3193_v49, %v3190_v28 }
 0xf80   :  { %v2477_v40 = vpop.eup %2476 }
 0xf81   :  { %1497 = vrot.lane.b32.xlu1 %v2477_v40, %s2639_s5 }
 0xf8d   :  { %v1592_v29 = vpop.permute.xlu0 %1591 }
 0xf8e   :  { %v3204_v6 = vadd.f32 %v1592_v29, %v1584_v47 }
 0xf90   :  { %2478 = vtanh.f32 %v3204_v6  ;;  %v1618_v29 = vsel %vm925_vm13, %v3204_v6, %v3201_v45 }
 0xf9d   :  { %v2479_v7 = vpop.eup %2478 }
 0xf9e   :  { %1597 = vrot.lane.b32.xlu0 %v2479_v7, %s2639_s5 }
 0xff3   :  { %v1498_v33 = vpop.permute.xlu1 %1497 }
 0xff4   :  { %v3208_v16 = vmul.f32 %v2471_v56, %v1498_v33 }
 0xff6   :  { %v3214_v59 = vsel %vm937_vm14, %v3208_v16, %v3142_v2  ;;  %v2513_v2 = vld [vmem:[#allocation8 + $0x10] sm:$0xff] }
 0xff7   :  { %1622 = vrot.lane.b32.xlu1 %v3214_v59, %s2640_s1 }
0x1010   :  { %v1598_v38 = vpop.permute.xlu0 %1597 }
0x1011   :  { %v3218_v3 = vmul.f32 %v2475_v43, %v1598_v38 }
0x1013   :  { %v3224_v18 = vsel %vm925_vm13, %v3218_v3, %v3152_v20  ;;  %v2515_v20 = vld [vmem:[#allocation8] sm:$0xff]  ;;  %v1608_v57 = vsel %vm925_vm13, %v3218_v3, 0.0 }
0x1014   :  { %1722 = vrot.lane.b32.xlu0 %v3224_v18, %s2640_s1 }
0x1069   :  { %v1623_v37 = vpop.permute.xlu1 %1622 }
0x106a   :  { %2333 = vmatmul.mubr.msk.f32.vlgmr.msra.gmra.mxu0 %vm276_vm6, %v1623_v37 }
0x106b   :  { %2347 = vmatpush3.msra.mxu0 %v3157_v52  ;;  %2354 = vmatprep.mubr.msk.f32.mxu0 %vm2637_vm0, %v2636_v0  ;;  %v2517_v52 = vld [vmem:[#allocation9 + $0x10] sm:$0xff] }
0x106c   :  { %2348 = vmatprep.subr.mxu0 %v2636_v0 }
0x106d   :  { %2349 = vmatpush3.msra.mxu0 %v2513_v2 }
0x106e   :  { %2350 = vmatprep.subr.mxu0 %v2636_v0 }
0x106f   :  { %2351 = vmatpush3.msra.mxu0 %v2514_v21 }
0x1070   :  { %2352 = vmatprep.subr.mxu0 %v2636_v0 }
0x1071   :  { %2353 = vmatpush3.msra.mxu0 %v2515_v20 }
0x1086   :  { %v1723_v22 = vpop.permute.xlu0 %1722 }
0x1087   :  { %2344 = vmatmul.mubr.msk.f32.vlgmr.msra.gmra.mxu1 %vm276_vm6, %v1723_v22 }
0x1088   :  { %2358 = vmatpush3.msra.mxu1 %v2516_v36  ;;  %2365 = vmatprep.mubr.msk.f32.mxu1 %vm2637_vm0, %v2636_v0 }
0x1089   :  { %2359 = vmatprep.subr.mxu1 %v2636_v0 }
0x108a   :  { %2360 = vmatpush3.msra.mxu1 %v2517_v52 }
0x108b   :  { %2361 = vmatprep.subr.mxu1 %v2636_v0 }
0x108c   :  { %2362 = vmatpush3.msra.mxu1 %v2518_v5 }
0x108d   :  { %2363 = vmatprep.subr.mxu1 %v2636_v0 }
0x108e   :  { %2364 = vmatpush3.msra.mxu1 %v2519_v8 }
0x112a   :  { %v1692_v9 = vpop.f32.mrf.mxu0 }
0x112b   :  { %v1696_v11 = vadd.f32 %v1692_v9, %v2802_v60 }
0x112c   :  { %v2334_v41 = vpop.f32.mrf.mxu0 }
0x112d   :  { %2480 = vtanh.f32 %v1696_v11  ;;  %v2105_v58 = vmul.f32 -1.442695, %v1696_v11 }
0x113a   :  { %v2481_v12 = vpop.eup %2480 }
0x113b   :  { %1706 = vrot.lane.b32.xlu1 %v2481_v12, %s2639_s5 }
0x1147   :  { %v1792_v62 = vpop.f32.mrf.mxu1 }
0x1148   :  { %v1796_v14 = vadd.f32 %v1792_v62, %v2783_v39 }
0x1149   :  { %v2345_v23 = vpop.f32.mrf.mxu1 }
0x114a   :  { %2482 = vtanh.f32 %v1796_v14  ;;  %v2107_v56 = vmul.f32 -1.442695, %v1796_v14 }
0x114b   :  { %2484 = vpow2.f32 %v2105_v58 }
0x1157   :  { %v2483_v15 = vpop.eup %2482 }
0x1158   :  { %1806 = vrot.lane.b32.xlu0 %v2483_v15, %s2639_s5  ;;  %v2485_v0 = vpop.eup %2484 }
0x1159   :  { %v1700_v24 = vadd.f32 1.0, %v2485_v0 }
0x115b   :  { %2486 = vrcp.f32 %v1700_v24 }
0x115c   :  { %2488 = vpow2.f32 %v2107_v56 }
0x1168   :  { %v2487_v60 = vpop.eup %2486 }
0x1169   :  { %v2489_v26 = vpop.eup %2488  ;;  %v1704_v30 = vmul.f32 %v2487_v60, %v1616_v27 }
0x116a   :  { %v1800_v54 = vadd.f32 1.0, %v2489_v26 }
0x116c   :  { %2490 = vrcp.f32 %v1800_v54 }
0x1179   :  { %v2491_v39 = vpop.eup %2490 }
0x117a   :  { %v1804_v7 = vmul.f32 %v2491_v39, %v1618_v29 }
0x11ad   :  { %v1707_v46 = vpop.permute.xlu1 %1706 }
0x11ae   :  { %v1709_v25 = vmul.f32 %v2487_v60, %v1707_v46 }
0x11b0   :  { %1711 = vrot.lane.b32.xlu1 %v1709_v25, %s2639_s5 }
0x11ca   :  { %v1807_v43 = vpop.permute.xlu0 %1806 }
0x11cb   :  { %v1809_v51 = vmul.f32 %v2491_v39, %v1807_v43  ;;  %v926_v43 = vsel %vm925_vm13, %v2982_v4, 0.0  ;;  %v1601_v4 = vsel %vm937_vm14, %v3208_v16, 0.0  ;;  %v938_v16 = vsel %vm937_vm14, %v2995_v10, 0.0 }
0x11cd   :  { %1811 = vrot.lane.b32.xlu0 %v1809_v51, %s2639_s5 }
0x1222   :  { %v1712_v35 = vpop.permute.xlu1 %1711 }
0x1223   :  { %v1714_v40 = vadd.f32 %v1712_v35, %v1704_v30 }
0x1225   :  { %2492 = vtanh.f32 %v1714_v40 }
0x1232   :  { %v2493_v47 = vpop.eup %2492 }
0x1233   :  { %1717 = vrot.lane.b32.xlu1 %v2493_v47, %s2639_s5 }
0x123f   :  { %v1812_v33 = vpop.permute.xlu0 %1811 }
0x1240   :  { %v1814_v38 = vadd.f32 %v1812_v33, %v1804_v7  ;;  %v1388_v7 = vsel %vm1155_vm2, %v3146_v44, 0.0 }
0x1242   :  { %2494 = vtanh.f32 %v1814_v38  ;;  %v1838_v51 = vsel %vm695_vm9, %v1814_v38, %v1618_v29  ;;  %v1168_v29 = vsel %vm1167_vm3, %v3075_v19, 0.0 }
0x124f   :  { %v2495_v37 = vpop.eup %2494 }
0x1250   :  { %1817 = vrot.lane.b32.xlu0 %v2495_v37, %s2639_s5 }
0x12a5   :  { %v1718_v28 = vpop.permute.xlu1 %1717 }
0x12a6   :  { %v3257_v49 = vmul.f32 %v2487_v60, %v1718_v28  ;;  %v1836_v60 = vsel %vm707_vm10, %v1714_v40, %v1616_v27  ;;  %v1156_v27 = vsel %vm1155_vm2, %v3062_v17, 0.0  ;;  %v1381_v40 = vsel %vm1167_vm3, %v3136_v13, 0.0 }
0x12a7   :  { %v708_v13 = vsel %vm707_vm10, %v2915_v61, 0.0 }
0x12a8   :  { %v1835_v2 = vsel %vm707_vm10, %v3257_v49, %v3214_v59  ;;  %v1821_v17 = vsel %vm707_vm10, %v3257_v49, 0.0 }
0x12a9   :  { %1842 = vrot.lane.b32.xlu1 %v1835_v2, %s2640_s1 }
0x12c2   :  { %v1818_v21 = vpop.permute.xlu0 %1817 }
0x12c3   :  { %v3264_v20 = vmul.f32 %v2491_v39, %v1818_v21  ;;  %v696_v39 = vsel %vm695_vm9, %v2902_v55, 0.0 }
0x12c5   :  { %v1837_v45 = vsel %vm695_vm9, %v3264_v20, %v3224_v18  ;;  %v1828_v61 = vsel %vm695_vm9, %v3264_v20, 0.0 }
0x12c6   :  { %1942 = vrot.lane.b32.xlu0 %v1837_v45, %s2640_s1 }
0x131b   :  { %v1843_v6 = vpop.permute.xlu1 %1842 }
0x131c   :  { %2355 = vmatmul.mubr.msk.f32.vlgmr.msra.gmra.mxu0 %vm276_vm6, %v1843_v6 }
0x1338   :  { %v1943_v22 = vpop.permute.xlu0 %1942 }
0x1339   :  { %2366 = vmatmul.mubr.msk.f32.vlgmr.msra.gmra.mxu1 %vm276_vm6, %v1943_v22 }
0x13dc   :  { %v1912_v36 = vpop.f32.mrf.mxu0 }
0x13dd   :  { %v1916_v59 = vadd.f32 %v1912_v36, %v2806_v1 }
0x13de   :  { %v2356_v52 = vpop.f32.mrf.mxu0 }
0x13df   :  { %2496 = vtanh.f32 %v1916_v59  ;;  %v2109_v41 = vmul.f32 -1.442695, %v1916_v59 }
0x13ec   :  { %v2497_v5 = vpop.eup %2496 }
0x13ed   :  { %1926 = vrot.lane.b32.xlu1 %v2497_v5, %s2639_s5 }
0x13f9   :  { %v2012_v8 = vpop.f32.mrf.mxu1 }
0x13fa   :  { %v2016_v9 = vadd.f32 %v2012_v8, %v2779_v32 }
0x13fb   :  { %v2367_v18 = vpop.f32.mrf.mxu1 }
0x13fc   :  { %2498 = vtanh.f32 %v2016_v9  ;;  %v2111_v14 = vmul.f32 -1.442695, %v2016_v9 }
0x13fd   :  { %2500 = vpow2.f32 %v2109_v41 }
0x1409   :  { %v2499_v11 = vpop.eup %2498 }
0x140a   :  { %2026 = vrot.lane.b32.xlu0 %v2499_v11, %s2639_s5  ;;  %v2501_v12 = vpop.eup %2500 }
0x140b   :  { %v1920_v62 = vadd.f32 1.0, %v2501_v12 }
0x140d   :  { %2502 = vrcp.f32 %v1920_v62 }
0x140e   :  { %2504 = vpow2.f32 %v2111_v14 }
0x141a   :  { %v2503_v1 = vpop.eup %2502 }
0x141b   :  { %v2505_v58 = vpop.eup %2504  ;;  %v1924_v46 = vmul.f32 %v2503_v1, %v1836_v60 }
0x141c   :  { %v2020_v0 = vadd.f32 1.0, %v2505_v58 }
0x141e   :  { %2506 = vrcp.f32 %v2020_v0 }
0x142b   :  { %v2507_v32 = vpop.eup %2506 }
0x142c   :  { %v2024_v30 = vmul.f32 %v2507_v32, %v1838_v51 }
0x145f   :  { %v1927_v23 = vpop.permute.xlu1 %1926 }
0x1460   :  { %v1929_v15 = vmul.f32 %v2503_v1, %v1927_v23 }
0x1462   :  { %1931 = vrot.lane.b32.xlu1 %v1929_v15, %s2639_s5 }
0x147c   :  { %v2027_v24 = vpop.permute.xlu0 %2026 }
0x147d   :  { %v2029_v56 = vmul.f32 %v2507_v32, %v2027_v24 }
0x147f   :  { %2031 = vrot.lane.b32.xlu0 %v2029_v56, %s2639_s5 }
0x14d4   :  { %v1932_v25 = vpop.permute.xlu1 %1931 }
0x14d5   :  { %v1934_v26 = vadd.f32 %v1932_v25, %v1924_v46 }
0x14d7   :  { %2508 = vtanh.f32 %v1934_v26 }
0x14e4   :  { %v2509_v54 = vpop.eup %2508 }
0x14e5   :  { %1937 = vrot.lane.b32.xlu1 %v2509_v54, %s2639_s5 }
0x14e9   :  { %698 = vrot.lane.b32.xlu1 %v696_v39, %s2640_s1 }
0x14ed   :  { %928 = vrot.lane.b32.xlu1 %v926_v43, %s2640_s1 }
0x14f1   :  { %1158 = vrot.lane.b32.xlu1 %v1156_v27, %s2640_s1  ;;  %v2032_v35 = vpop.permute.xlu0 %2031 }
0x14f2   :  { %v2034_v55 = vadd.f32 %v2032_v35, %v2024_v30 }
0x14f4   :  { %2510 = vtanh.f32 %v2034_v55 }
0x14f5   :  { %1383 = vrot.lane.b32.xlu1 %v1381_v40, %s2640_s1 }
0x14f9   :  { %1603 = vrot.lane.b32.xlu1 %v1601_v4, %s2640_s1 }
0x14fd   :  { %1823 = vrot.lane.b32.xlu1 %v1821_v17, %s2640_s1 }
0x1501   :  { %v2511_v47 = vpop.eup %2510 }
0x1502   :  { %2037 = vrot.lane.b32.xlu0 %v2511_v47, %s2639_s5 }
0x1506   :  { %710 = vrot.lane.b32.xlu0 %v708_v13, %s2640_s1 }
0x150a   :  { %940 = vrot.lane.b32.xlu0 %v938_v16, %s2640_s1 }
0x150e   :  { %1170 = vrot.lane.b32.xlu0 %v1168_v29, %s2640_s1 }
0x1512   :  { %1390 = vrot.lane.b32.xlu0 %v1388_v7, %s2640_s1 }
0x1516   :  { %1610 = vrot.lane.b32.xlu0 %v1608_v57, %s2640_s1 }
0x151a   :  { %1830 = vrot.lane.b32.xlu0 %v1828_v61, %s2640_s1 }
0x1557   :  { %v1938_v31 = vpop.permute.xlu1 %1937 }
0x1558   :  { %v1940_v10 = vmul.f32 %v2503_v1, %v1938_v31 }
0x155a   :  { %v2041_v63 = vsel %vm485_vm5, %v1940_v10, 0.0 }
0x155b   :  { %v699_v34 = vpop.permute.xlu1 %698  ;;  %2043 = vrot.lane.b32.xlu1 %v2041_v63, %s2640_s1 }
0x155c   :  { %702 = vst.msk [vmem:[#allocation11 + $0x8] sm:$0xff] %vm276_vm6, %v699_v34 }
0x155f   :  { %v929_v53 = vpop.permute.xlu1 %928 }
0x1560   :  { %932 = vst.msk [vmem:[#allocation11 + $0x10] sm:$0xff] %vm276_vm6, %v929_v53 }
0x1563   :  { %v1159_v19 = vpop.permute.xlu1 %1158 }
0x1564   :  { %1162 = vst.msk [vmem:[#allocation11 + $0x18] sm:$0xff] %vm276_vm6, %v1159_v19 }
0x1567   :  { %v1384_v50 = vpop.permute.xlu1 %1383 }
0x1568   :  { %1387 = vst.msk [vmem:[#allocation11 + $0x20] sm:$0xff] %vm276_vm6, %v1384_v50 }
0x156b   :  { %v1604_v44 = vpop.permute.xlu1 %1603 }
0x156c   :  { %1607 = vst.msk [vmem:[#allocation11 + $0x28] sm:$0xff] %vm276_vm6, %v1604_v44 }
0x156f   :  { %v1824_v3 = vpop.permute.xlu1 %1823 }
0x1570   :  { %1827 = vst.msk [vmem:[#allocation11 + $0x30] sm:$0xff] %vm276_vm6, %v1824_v3 }
0x1574   :  { %v2038_v48 = vpop.permute.xlu0 %2037 }
0x1575   :  { %v2040_v33 = vmul.f32 %v2507_v32, %v2038_v48 }
0x1577   :  { %v2048_v38 = vsel %vm474_vm4, %v2040_v33, 0.0 }
0x1578   :  { %2050 = vrot.lane.b32.xlu0 %v2048_v38, %s2640_s1  ;;  %v711_v37 = vpop.permute.xlu0 %710 }
0x1579   :  { %714 = vst.msk [vmem:[#allocation11 + $0x70] sm:$0xff] %vm276_vm6, %v711_v37 }
0x157c   :  { %v941_v28 = vpop.permute.xlu0 %940 }
0x157d   :  { %944 = vst.msk [vmem:[#allocation11 + $0x68] sm:$0xff] %vm276_vm6, %v941_v28 }
0x1580   :  { %v1171_v49 = vpop.permute.xlu0 %1170 }
0x1581   :  { %1174 = vst.msk [vmem:[#allocation11 + $0x60] sm:$0xff] %vm276_vm6, %v1171_v49 }
0x1584   :  { %v1391_v2 = vpop.permute.xlu0 %1390 }
0x1585   :  { %1394 = vst.msk [vmem:[#allocation11 + $0x58] sm:$0xff] %vm276_vm6, %v1391_v2 }
0x1588   :  { %v1611_v21 = vpop.permute.xlu0 %1610 }
0x1589   :  { %1614 = vst.msk [vmem:[#allocation11 + $0x50] sm:$0xff] %vm276_vm6, %v1611_v21 }
0x158c   :  { %v1831_v20 = vpop.permute.xlu0 %1830 }
0x158d   :  { %1834 = vst.msk [vmem:[#allocation11 + $0x48] sm:$0xff] %vm276_vm6, %v1831_v20 }
0x15cd   :  { %v2044_v42 = vpop.permute.xlu1 %2043 }
0x15ce   :  { %2047 = vst.msk [vmem:[#allocation11 + $0x38] sm:$0xff] %vm276_vm6, %v2044_v42 }
0x15ea   :  { %v2051_v45 = vpop.permute.xlu0 %2050 }
0x15eb   :  { %2054 = vst.msk [vmem:[#allocation11 + $0x40] sm:$0xff] %vm276_vm6, %v2051_v45 }
0x15ec   :  { %2611 = shalt.err (!%p2608_p10)
}
0x15ed   :  { %2066 = dma.vmem_to_hbm [thread:$0]  %s2061_s22, 2048, %s3365_s6, [#allocation5], %s2632_s7, %s2632_s7, %s2633_s8  }
0x15ee   :  { %2626 = dma.done.wait [#allocation5], 2048  }
0x15ef   :  { %2627 = vsyncadd [#allocation5], 4294965248 }
0x15f0   :  { %2070 = vsyncpa [#allocation4], 1 }
0x15f1   :  { %2071 = vsyncpa [#allocation7], 1 }
0x15f2   :  { %2072 = vsyncpa [#allocation10], 1 }
0x15f3   :  { %2073 = vsyncpa [#allocation5], 1 }

</bundles_post_ra>
